<compile_context>
chip_gen: v6e
topology: v6e:2x2x1
jax: 0.10.0
libtpu: 0.0.40
codegen_flags: <defaults>
</compile_context>

<pallas_src>
import jax
import jax.numpy as jnp
from jax import lax
from jax.experimental import pallas as pl
from jax.experimental.pallas import tpu as pltpu

# Small shapes consistent with the module's forward.
INPUT_DIM = 16
HID_DIM = 32
NUM_LAYERS = 3      # nn.RNN(..., num_layers=3) is hard-coded in the module
OUTPUT_DIM = 8
SEQ_LEN = 8
H2 = 2 * HID_DIM    # fwd|bwd concatenated hidden width

# ---- static row layout of the packed weight slab (all offsets multiples of 8) ----
IN_DIMS = (INPUT_DIM, H2, H2)   # per-layer input width
MISC_OFF = 0                     # rows 0..2: fused biases, 3..5: h0 per layer, 6: final bias
_off = 8
WIH_OFF, WHH_OFF = [], []
for _l in range(NUM_LAYERS):
    WIH_OFF.append(_off); _off += IN_DIMS[_l]
    WHH_OFF.append(_off); _off += H2
WF_OFF = _off; _off += H2
SLAB_ROWS = _off                 # = 408


def _fused_mrnn_kernel(x_ref, slab_ref, out_ref, hn_ref):
    """Whole MilliesRNN forward, fully VMEM-resident, single invocation.

    x_ref:    (seq, input_dim)
    slab_ref: (SLAB_ROWS, 2H) packed constants:
       rows MISC_OFF+l         : b_ih_f+b_hh_f | b_ih_b+b_hh_b   (layer l)
       rows MISC_OFF+3+l       : [h0_fwd | h0_bwd]               (layer l)
       row  MISC_OFF+6         : final bias (lanes [0, OUTPUT_DIM))
       rows WIH_OFF[l]..       : [W_ih_fwd^T | W_ih_bwd^T]       (in_l, 2H)
       rows WHH_OFF[l]..       : blockdiag(W_hh_fwd^T, W_hh_bwd^T) (2H, 2H)
       rows WF_OFF..           : final_w^T zero-padded to (2H, 2H)
    out_ref:  (seq, output_dim)
    hn_ref:   (num_layers, 2H)  (wrapper reshapes to (2L, H))
    """
    misc = slab_ref[pl.ds(MISC_OFF, 8), :]                    # (8, 2H)

    # Lane mask: fwd direction = lanes [0,H), bwd = [H,2H). Built once at full
    # (seq, 2H) shape so no broadcasts sit inside the loops.
    lane_ids = lax.broadcasted_iota(jnp.int32, (SEQ_LEN, H2), 1)
    fwd_mask = lane_ids < HID_DIM                             # (seq, 2H) bool

    cur_in = x_ref[...]                                       # (seq, in_dim)
    hn_rows = []

    for l in range(NUM_LAYERS):
        wih = slab_ref[pl.ds(WIH_OFF[l], IN_DIMS[l]), :]      # (in_l, 2H)
        whh = slab_ref[pl.ds(WHH_OFF[l], H2), :]              # (2H, 2H) block-diag
        b = misc[l:l + 1, :]                                  # (1, 2H) pre-summed biases

        # Hoisted input projection for BOTH directions + biases:
        # one (seq, in)@(in, 2H) matmul per layer.
        xw = jnp.dot(cur_in, wih, preferred_element_type=jnp.float32) + b   # (seq, 2H)

        # Hoisted direction select: fwd half keeps time order, bwd half is the
        # time-reversed rows (static slices + one concat + one select, once per
        # layer — nothing of this sits on the per-step critical path).
        xw_rev = jnp.concatenate(
            [xw[SEQ_LEN - 1 - t:SEQ_LEN - t, :] for t in range(SEQ_LEN)], axis=0)
        xsel = jnp.where(fwd_mask, xw, xw_rev)                # (seq, 2H)

        h = misc[3 + l:4 + l, :]                              # (1, 2H) = [h0_fwd | h0_bwd]
        h_steps = []
        # seq=8 static -> fully unrolled; per-step chain is matmul + add + tanh.
        for s in range(SEQ_LEN):
            h = jnp.tanh(xsel[s:s + 1, :]
                         + jnp.dot(h, whh, preferred_element_type=jnp.float32))
            h_steps.append(h)                                 # stays in vregs

        hn_rows.append(h_steps[-1])                           # fwd ended t=T-1, bwd ended t=0

        # Assemble the layer output in original (PyTorch) time order, in vregs:
        # row t = [h_fwd(t) | h_bwd(t)] = [h_steps[t][:H] | h_steps[T-1-t][H:]].
        fwd_stack = jnp.concatenate(h_steps, axis=0)          # (seq, 2H)
        bwd_stack = jnp.concatenate(h_steps[::-1], axis=0)    # (seq, 2H)
        cur_in = jnp.where(fwd_mask, fwd_stack, bwd_stack)    # (seq, 2H)

    # Final hidden states: one lane-dense (L, 2H) store.
    hn_ref[...] = jnp.concatenate(hn_rows, axis=0)

    # Final Linear, fused: (seq, 2H) @ (2H, 2H zero-padded) then slice valid lanes.
    wf = slab_ref[pl.ds(WF_OFF, H2), :]                       # (2H, 2H) cols >=OUT zero
    y = jnp.dot(cur_in, wf, preferred_element_type=jnp.float32)
    out_ref[...] = y[:, :OUTPUT_DIM] + misc[6:7, :OUTPUT_DIM]


def _build_weight_slab(params, h0):
    """Pack every constant (weights, biases, h0, final layer) into one lane-dense
    (SLAB_ROWS, 2H) f32 slab. Runs under jit with params as closure constants, so
    it constant-folds; move it out of jit if params ever become traced args."""
    misc = jnp.zeros((8, H2), jnp.float32)
    b_rows = []
    for l in range(NUM_LAYERS):
        _, _, b_ih_f, b_hh_f = params["rnn"][l][0]
        _, _, b_ih_b, b_hh_b = params["rnn"][l][1]
        b_rows.append(jnp.concatenate([b_ih_f + b_hh_f, b_ih_b + b_hh_b]))
    misc = misc.at[0:NUM_LAYERS].set(jnp.stack(b_rows))
    misc = misc.at[3:3 + NUM_LAYERS].set(h0.reshape(NUM_LAYERS, H2))
    misc = misc.at[6, :OUTPUT_DIM].set(params["final_b"])

    pieces = [misc]
    z = jnp.zeros((HID_DIM, HID_DIM), jnp.float32)
    for l in range(NUM_LAYERS):
        w_ih_f, w_hh_f, _, _ = params["rnn"][l][0]
        w_ih_b, w_hh_b, _, _ = params["rnn"][l][1]
        pieces.append(jnp.concatenate([w_ih_f.T, w_ih_b.T], axis=1))    # (in_l, 2H)
        pieces.append(jnp.block([[w_hh_f.T, z], [z, w_hh_b.T]]))        # (2H, 2H)
    wf_pad = jnp.zeros((H2, H2), jnp.float32).at[:, :OUTPUT_DIM].set(params["final_w"].T)
    pieces.append(wf_pad)
    slab = jnp.concatenate(pieces, axis=0)
    assert slab.shape == (SLAB_ROWS, H2)
    return slab


def millies_rnn_forward(data, params, h0):
    """data: (seq, input_dim); h0: (2*num_layers, hid).
    Returns (output (seq, output_dim), hn (2*num_layers, hid))."""
    slab = _build_weight_slab(params, h0)      # constant-folded under jit
    vmem = pl.BlockSpec(memory_space=pltpu.MemorySpace.VMEM)

    output, hn_cat = pl.pallas_call(
        _fused_mrnn_kernel,
        out_shape=(jax.ShapeDtypeStruct((SEQ_LEN, OUTPUT_DIM), jnp.float32),
                   jax.ShapeDtypeStruct((NUM_LAYERS, H2), jnp.float32)),
        in_specs=[vmem, vmem],
        out_specs=(vmem, vmem),
    )(data, slab)
    # Row l = [h_fwd | h_bwd] -> contiguous reshape gives PyTorch's (2L, H) order.
    return output, hn_cat.reshape(2 * NUM_LAYERS, HID_DIM)


def init_params(key):
    """Deterministic parameter init mirroring PyTorch's default inits."""
    params = {"rnn": []}
    k_rnn = 1.0 / float(HID_DIM) ** 0.5
    keys = jax.random.split(key, NUM_LAYERS * 2 * 4 + 3)
    ki = iter(range(len(keys)))
    for layer in range(NUM_LAYERS):
        in_dim = INPUT_DIM if layer == 0 else 2 * HID_DIM
        layer_params = []
        for _d in range(2):
            w_ih = jax.random.uniform(keys[next(ki)], (HID_DIM, in_dim),
                                      jnp.float32, -k_rnn, k_rnn)
            w_hh = jax.random.uniform(keys[next(ki)], (HID_DIM, HID_DIM),
                                      jnp.float32, -k_rnn, k_rnn)
            b_ih = jax.random.uniform(keys[next(ki)], (HID_DIM,),
                                      jnp.float32, -k_rnn, k_rnn)
            b_hh = jax.random.uniform(keys[next(ki)], (HID_DIM,),
                                      jnp.float32, -k_rnn, k_rnn)
            layer_params.append((w_ih, w_hh, b_ih, b_hh))
        params["rnn"].append(layer_params)
    k_lin = 1.0 / float(2 * HID_DIM) ** 0.5
    params["final_w"] = jax.random.uniform(keys[next(ki)],
                                           (OUTPUT_DIM, 2 * HID_DIM),
                                           jnp.float32, -k_lin, k_lin)
    params["final_b"] = jax.random.uniform(keys[next(ki)], (OUTPUT_DIM,),
                                           jnp.float32, -k_lin, k_lin)
    # init_hidden(): kaiming_uniform_ on (2*num_layers, hid): bound = sqrt(6/fan_in)
    bound = float(6.0 / HID_DIM) ** 0.5
    params["h0"] = jax.random.uniform(keys[next(ki)],
                                      (2 * NUM_LAYERS, HID_DIM),
                                      jnp.float32, -bound, bound)
    return params


def _reference_forward(data, params, h0):
    """Pure-JAX reference matching PyTorch nn.RNN(bidirectional) + Linear."""
    hi = lax.Precision.HIGHEST
    x = data
    hn_list = []
    for l in range(NUM_LAYERS):
        outs = []
        for d in range(2):
            w_ih, w_hh, b_ih, b_hh = params["rnn"][l][d]
            h = h0[2 * l + d]
            order = range(SEQ_LEN) if d == 0 else range(SEQ_LEN - 1, -1, -1)
            out_t = [None] * SEQ_LEN
            for t in order:
                h = jnp.tanh(jnp.dot(x[t], w_ih.T, precision=hi) + b_ih
                             + jnp.dot(h, w_hh.T, precision=hi) + b_hh)
                out_t[t] = h
            outs.append(jnp.stack(out_t, axis=0))
            hn_list.append(h)
        x = jnp.concatenate(outs, axis=-1)
    output = jnp.dot(x, params["final_w"].T, precision=hi) + params["final_b"]
    return output, jnp.stack(hn_list, axis=0)


if __name__ == "__main__":
    root = jax.random.PRNGKey(0)
    k_data, k_params = jax.random.split(root)
    data = jax.random.normal(k_data, (SEQ_LEN, INPUT_DIM), jnp.float32)
    params = init_params(k_params)

    fwd = jax.jit(lambda x: millies_rnn_forward(x, params, params["h0"]))
    output, hn = fwd(data)
    jax.block_until_ready((output, hn))

    assert output.shape == (SEQ_LEN, OUTPUT_DIM)
    assert hn.shape == (2 * NUM_LAYERS, HID_DIM)
    assert bool(jnp.all(jnp.isfinite(output))) and bool(jnp.all(jnp.isfinite(hn)))

    ref_out, ref_hn = _reference_forward(data, params, params["h0"])
    assert bool(jnp.allclose(output, ref_out, atol=2e-2, rtol=2e-2))
    assert bool(jnp.allclose(hn, ref_hn, atol=2e-2, rtol=2e-2))
    print("KERNEL_OK")
</pallas_src>

<mosaic_0001>
module attributes {stable_mosaic.version = 11 : i64} {
  func.func @_fused_mrnn_kernel(%arg0: memref<8x16xf32, #tpu.memory_space<vmem>>, %arg1: memref<408x64xf32, #tpu.memory_space<vmem>>, %arg2: memref<8x8xf32, #tpu.memory_space<vmem>>, %arg3: memref<3x64xf32, #tpu.memory_space<vmem>>) attributes {dimension_semantics = [], scalar_prefetch = 0 : i64, scratch_operands = 0 : i64, tpu.core_type = #tpu.core_type<tc>} {
    %c0 = arith.constant 0 : index
    %c0_0 = arith.constant 0 : index
    %0 = vector.load %arg1[%c0, %c0_0] : memref<408x64xf32, #tpu.memory_space<vmem>>, vector<8x64xf32>
    %1 = tpu.iota {dimensions = array<i32: 1>} : vector<8x64xi32>
    %c32_i32 = arith.constant 32 : i32
    %2 = vector.broadcast %c32_i32 : i32 to vector<8x64xi32>
    %3 = arith.cmpi slt, %1, %2 : vector<8x64xi32>
    %c0_1 = arith.constant 0 : index
    %c0_2 = arith.constant 0 : index
    %4 = vector.load %arg0[%c0_1, %c0_2] : memref<8x16xf32, #tpu.memory_space<vmem>>, vector<8x16xf32>
    %c8 = arith.constant 8 : index
    %c0_3 = arith.constant 0 : index
    %5 = vector.load %arg1[%c8, %c0_3] : memref<408x64xf32, #tpu.memory_space<vmem>>, vector<16x64xf32>
    %c24 = arith.constant 24 : index
    %c0_4 = arith.constant 0 : index
    %6 = vector.load %arg1[%c24, %c0_4] : memref<408x64xf32, #tpu.memory_space<vmem>>, vector<64x64xf32>
    %7 = vector.extract_strided_slice %0 {offsets = [0, 0], sizes = [1, 64], strides = [1, 1]} : vector<8x64xf32> to vector<1x64xf32>
    %cst = arith.constant dense<0.000000e+00> : vector<8x64xf32>
    %8 = tpu.matmul %4, %5, %cst {dimension_numbers = #tpu.dot_dimension_numbers<[1], [0], [0], [1], [0, 0, 1, 1], [], []>} : vector<8x16xf32>, vector<16x64xf32>, vector<8x64xf32> -> vector<8x64xf32>
    %9 = vector.broadcast %7 : vector<1x64xf32> to vector<8x64xf32>
    %10 = arith.addf %8, %9 : vector<8x64xf32>
    %11 = vector.extract_strided_slice %10 {offsets = [7, 0], sizes = [1, 64], strides = [1, 1]} : vector<8x64xf32> to vector<1x64xf32>
    %12 = vector.extract_strided_slice %10 {offsets = [6, 0], sizes = [1, 64], strides = [1, 1]} : vector<8x64xf32> to vector<1x64xf32>
    %13 = vector.extract_strided_slice %10 {offsets = [5, 0], sizes = [1, 64], strides = [1, 1]} : vector<8x64xf32> to vector<1x64xf32>
    %14 = vector.extract_strided_slice %10 {offsets = [4, 0], sizes = [1, 64], strides = [1, 1]} : vector<8x64xf32> to vector<1x64xf32>
    %15 = vector.extract_strided_slice %10 {offsets = [3, 0], sizes = [1, 64], strides = [1, 1]} : vector<8x64xf32> to vector<1x64xf32>
    %16 = vector.extract_strided_slice %10 {offsets = [2, 0], sizes = [1, 64], strides = [1, 1]} : vector<8x64xf32> to vector<1x64xf32>
    %17 = vector.extract_strided_slice %10 {offsets = [1, 0], sizes = [1, 64], strides = [1, 1]} : vector<8x64xf32> to vector<1x64xf32>
    %18 = vector.extract_strided_slice %10 {offsets = [0, 0], sizes = [1, 64], strides = [1, 1]} : vector<8x64xf32> to vector<1x64xf32>
    %19 = tpu.concatenate %11, %12, %13, %14, %15, %16, %17, %18 in 0 : vector<1x64xf32>, vector<1x64xf32>, vector<1x64xf32>, vector<1x64xf32>, vector<1x64xf32>, vector<1x64xf32>, vector<1x64xf32>, vector<1x64xf32> -> vector<8x64xf32>
    %20 = arith.select %3, %10, %19 : vector<8x64xi1>, vector<8x64xf32>
    %21 = vector.extract_strided_slice %0 {offsets = [3, 0], sizes = [1, 64], strides = [1, 1]} : vector<8x64xf32> to vector<1x64xf32>
    %22 = vector.extract_strided_slice %20 {offsets = [0, 0], sizes = [1, 64], strides = [1, 1]} : vector<8x64xf32> to vector<1x64xf32>
    %cst_5 = arith.constant dense<0.000000e+00> : vector<1x64xf32>
    %23 = tpu.matmul %21, %6, %cst_5 {dimension_numbers = #tpu.dot_dimension_numbers<[1], [0], [0], [1], [0, 0, 1, 1], [], []>} : vector<1x64xf32>, vector<64x64xf32>, vector<1x64xf32> -> vector<1x64xf32>
    %24 = arith.addf %22, %23 : vector<1x64xf32>
    %25 = math.tanh %24 : vector<1x64xf32>
    %26 = vector.extract_strided_slice %20 {offsets = [1, 0], sizes = [1, 64], strides = [1, 1]} : vector<8x64xf32> to vector<1x64xf32>
    %cst_6 = arith.constant dense<0.000000e+00> : vector<1x64xf32>
    %27 = tpu.matmul %25, %6, %cst_6 {dimension_numbers = #tpu.dot_dimension_numbers<[1], [0], [0], [1], [0, 0, 1, 1], [], []>} : vector<1x64xf32>, vector<64x64xf32>, vector<1x64xf32> -> vector<1x64xf32>
    %28 = arith.addf %26, %27 : vector<1x64xf32>
    %29 = math.tanh %28 : vector<1x64xf32>
    %30 = vector.extract_strided_slice %20 {offsets = [2, 0], sizes = [1, 64], strides = [1, 1]} : vector<8x64xf32> to vector<1x64xf32>
    %cst_7 = arith.constant dense<0.000000e+00> : vector<1x64xf32>
    %31 = tpu.matmul %29, %6, %cst_7 {dimension_numbers = #tpu.dot_dimension_numbers<[1], [0], [0], [1], [0, 0, 1, 1], [], []>} : vector<1x64xf32>, vector<64x64xf32>, vector<1x64xf32> -> vector<1x64xf32>
    %32 = arith.addf %30, %31 : vector<1x64xf32>
    %33 = math.tanh %32 : vector<1x64xf32>
    %34 = vector.extract_strided_slice %20 {offsets = [3, 0], sizes = [1, 64], strides = [1, 1]} : vector<8x64xf32> to vector<1x64xf32>
    %cst_8 = arith.constant dense<0.000000e+00> : vector<1x64xf32>
    %35 = tpu.matmul %33, %6, %cst_8 {dimension_numbers = #tpu.dot_dimension_numbers<[1], [0], [0], [1], [0, 0, 1, 1], [], []>} : vector<1x64xf32>, vector<64x64xf32>, vector<1x64xf32> -> vector<1x64xf32>
    %36 = arith.addf %34, %35 : vector<1x64xf32>
    %37 = math.tanh %36 : vector<1x64xf32>
    %38 = vector.extract_strided_slice %20 {offsets = [4, 0], sizes = [1, 64], strides = [1, 1]} : vector<8x64xf32> to vector<1x64xf32>
    %cst_9 = arith.constant dense<0.000000e+00> : vector<1x64xf32>
    %39 = tpu.matmul %37, %6, %cst_9 {dimension_numbers = #tpu.dot_dimension_numbers<[1], [0], [0], [1], [0, 0, 1, 1], [], []>} : vector<1x64xf32>, vector<64x64xf32>, vector<1x64xf32> -> vector<1x64xf32>
    %40 = arith.addf %38, %39 : vector<1x64xf32>
    %41 = math.tanh %40 : vector<1x64xf32>
    %42 = vector.extract_strided_slice %20 {offsets = [5, 0], sizes = [1, 64], strides = [1, 1]} : vector<8x64xf32> to vector<1x64xf32>
    %cst_10 = arith.constant dense<0.000000e+00> : vector<1x64xf32>
    %43 = tpu.matmul %41, %6, %cst_10 {dimension_numbers = #tpu.dot_dimension_numbers<[1], [0], [0], [1], [0, 0, 1, 1], [], []>} : vector<1x64xf32>, vector<64x64xf32>, vector<1x64xf32> -> vector<1x64xf32>
    %44 = arith.addf %42, %43 : vector<1x64xf32>
    %45 = math.tanh %44 : vector<1x64xf32>
    %46 = vector.extract_strided_slice %20 {offsets = [6, 0], sizes = [1, 64], strides = [1, 1]} : vector<8x64xf32> to vector<1x64xf32>
    %cst_11 = arith.constant dense<0.000000e+00> : vector<1x64xf32>
    %47 = tpu.matmul %45, %6, %cst_11 {dimension_numbers = #tpu.dot_dimension_numbers<[1], [0], [0], [1], [0, 0, 1, 1], [], []>} : vector<1x64xf32>, vector<64x64xf32>, vector<1x64xf32> -> vector<1x64xf32>
    %48 = arith.addf %46, %47 : vector<1x64xf32>
    %49 = math.tanh %48 : vector<1x64xf32>
    %50 = vector.extract_strided_slice %20 {offsets = [7, 0], sizes = [1, 64], strides = [1, 1]} : vector<8x64xf32> to vector<1x64xf32>
    %cst_12 = arith.constant dense<0.000000e+00> : vector<1x64xf32>
    %51 = tpu.matmul %49, %6, %cst_12 {dimension_numbers = #tpu.dot_dimension_numbers<[1], [0], [0], [1], [0, 0, 1, 1], [], []>} : vector<1x64xf32>, vector<64x64xf32>, vector<1x64xf32> -> vector<1x64xf32>
    %52 = arith.addf %50, %51 : vector<1x64xf32>
    %53 = math.tanh %52 : vector<1x64xf32>
    %54 = tpu.concatenate %25, %29, %33, %37, %41, %45, %49, %53 in 0 : vector<1x64xf32>, vector<1x64xf32>, vector<1x64xf32>, vector<1x64xf32>, vector<1x64xf32>, vector<1x64xf32>, vector<1x64xf32>, vector<1x64xf32> -> vector<8x64xf32>
    %55 = tpu.concatenate %53, %49, %45, %41, %37, %33, %29, %25 in 0 : vector<1x64xf32>, vector<1x64xf32>, vector<1x64xf32>, vector<1x64xf32>, vector<1x64xf32>, vector<1x64xf32>, vector<1x64xf32>, vector<1x64xf32> -> vector<8x64xf32>
    %56 = arith.select %3, %54, %55 : vector<8x64xi1>, vector<8x64xf32>
    %c88 = arith.constant 88 : index
    %c0_13 = arith.constant 0 : index
    %57 = vector.load %arg1[%c88, %c0_13] : memref<408x64xf32, #tpu.memory_space<vmem>>, vector<64x64xf32>
    %c152 = arith.constant 152 : index
    %c0_14 = arith.constant 0 : index
    %58 = vector.load %arg1[%c152, %c0_14] : memref<408x64xf32, #tpu.memory_space<vmem>>, vector<64x64xf32>
    %59 = vector.extract_strided_slice %0 {offsets = [1, 0], sizes = [1, 64], strides = [1, 1]} : vector<8x64xf32> to vector<1x64xf32>
    %cst_15 = arith.constant dense<0.000000e+00> : vector<8x64xf32>
    %60 = tpu.matmul %56, %57, %cst_15 {dimension_numbers = #tpu.dot_dimension_numbers<[1], [0], [0], [1], [0, 0, 1, 1], [], []>} : vector<8x64xf32>, vector<64x64xf32>, vector<8x64xf32> -> vector<8x64xf32>
    %61 = vector.broadcast %59 : vector<1x64xf32> to vector<8x64xf32>
    %62 = arith.addf %60, %61 : vector<8x64xf32>
    %63 = vector.extract_strided_slice %62 {offsets = [7, 0], sizes = [1, 64], strides = [1, 1]} : vector<8x64xf32> to vector<1x64xf32>
    %64 = vector.extract_strided_slice %62 {offsets = [6, 0], sizes = [1, 64], strides = [1, 1]} : vector<8x64xf32> to vector<1x64xf32>
    %65 = vector.extract_strided_slice %62 {offsets = [5, 0], sizes = [1, 64], strides = [1, 1]} : vector<8x64xf32> to vector<1x64xf32>
    %66 = vector.extract_strided_slice %62 {offsets = [4, 0], sizes = [1, 64], strides = [1, 1]} : vector<8x64xf32> to vector<1x64xf32>
    %67 = vector.extract_strided_slice %62 {offsets = [3, 0], sizes = [1, 64], strides = [1, 1]} : vector<8x64xf32> to vector<1x64xf32>
    %68 = vector.extract_strided_slice %62 {offsets = [2, 0], sizes = [1, 64], strides = [1, 1]} : vector<8x64xf32> to vector<1x64xf32>
    %69 = vector.extract_strided_slice %62 {offsets = [1, 0], sizes = [1, 64], strides = [1, 1]} : vector<8x64xf32> to vector<1x64xf32>
    %70 = vector.extract_strided_slice %62 {offsets = [0, 0], sizes = [1, 64], strides = [1, 1]} : vector<8x64xf32> to vector<1x64xf32>
    %71 = tpu.concatenate %63, %64, %65, %66, %67, %68, %69, %70 in 0 : vector<1x64xf32>, vector<1x64xf32>, vector<1x64xf32>, vector<1x64xf32>, vector<1x64xf32>, vector<1x64xf32>, vector<1x64xf32>, vector<1x64xf32> -> vector<8x64xf32>
    %72 = arith.select %3, %62, %71 : vector<8x64xi1>, vector<8x64xf32>
    %73 = vector.extract_strided_slice %0 {offsets = [4, 0], sizes = [1, 64], strides = [1, 1]} : vector<8x64xf32> to vector<1x64xf32>
    %74 = vector.extract_strided_slice %72 {offsets = [0, 0], sizes = [1, 64], strides = [1, 1]} : vector<8x64xf32> to vector<1x64xf32>
    %cst_16 = arith.constant dense<0.000000e+00> : vector<1x64xf32>
    %75 = tpu.matmul %73, %58, %cst_16 {dimension_numbers = #tpu.dot_dimension_numbers<[1], [0], [0], [1], [0, 0, 1, 1], [], []>} : vector<1x64xf32>, vector<64x64xf32>, vector<1x64xf32> -> vector<1x64xf32>
    %76 = arith.addf %74, %75 : vector<1x64xf32>
    %77 = math.tanh %76 : vector<1x64xf32>
    %78 = vector.extract_strided_slice %72 {offsets = [1, 0], sizes = [1, 64], strides = [1, 1]} : vector<8x64xf32> to vector<1x64xf32>
    %cst_17 = arith.constant dense<0.000000e+00> : vector<1x64xf32>
    %79 = tpu.matmul %77, %58, %cst_17 {dimension_numbers = #tpu.dot_dimension_numbers<[1], [0], [0], [1], [0, 0, 1, 1], [], []>} : vector<1x64xf32>, vector<64x64xf32>, vector<1x64xf32> -> vector<1x64xf32>
    %80 = arith.addf %78, %79 : vector<1x64xf32>
    %81 = math.tanh %80 : vector<1x64xf32>
    %82 = vector.extract_strided_slice %72 {offsets = [2, 0], sizes = [1, 64], strides = [1, 1]} : vector<8x64xf32> to vector<1x64xf32>
    %cst_18 = arith.constant dense<0.000000e+00> : vector<1x64xf32>
    %83 = tpu.matmul %81, %58, %cst_18 {dimension_numbers = #tpu.dot_dimension_numbers<[1], [0], [0], [1], [0, 0, 1, 1], [], []>} : vector<1x64xf32>, vector<64x64xf32>, vector<1x64xf32> -> vector<1x64xf32>
    %84 = arith.addf %82, %83 : vector<1x64xf32>
    %85 = math.tanh %84 : vector<1x64xf32>
    %86 = vector.extract_strided_slice %72 {offsets = [3, 0], sizes = [1, 64], strides = [1, 1]} : vector<8x64xf32> to vector<1x64xf32>
    %cst_19 = arith.constant dense<0.000000e+00> : vector<1x64xf32>
    %87 = tpu.matmul %85, %58, %cst_19 {dimension_numbers = #tpu.dot_dimension_numbers<[1], [0], [0], [1], [0, 0, 1, 1], [], []>} : vector<1x64xf32>, vector<64x64xf32>, vector<1x64xf32> -> vector<1x64xf32>
    %88 = arith.addf %86, %87 : vector<1x64xf32>
    %89 = math.tanh %88 : vector<1x64xf32>
    %90 = vector.extract_strided_slice %72 {offsets = [4, 0], sizes = [1, 64], strides = [1, 1]} : vector<8x64xf32> to vector<1x64xf32>
    %cst_20 = arith.constant dense<0.000000e+00> : vector<1x64xf32>
    %91 = tpu.matmul %89, %58, %cst_20 {dimension_numbers = #tpu.dot_dimension_numbers<[1], [0], [0], [1], [0, 0, 1, 1], [], []>} : vector<1x64xf32>, vector<64x64xf32>, vector<1x64xf32> -> vector<1x64xf32>
    %92 = arith.addf %90, %91 : vector<1x64xf32>
    %93 = math.tanh %92 : vector<1x64xf32>
    %94 = vector.extract_strided_slice %72 {offsets = [5, 0], sizes = [1, 64], strides = [1, 1]} : vector<8x64xf32> to vector<1x64xf32>
    %cst_21 = arith.constant dense<0.000000e+00> : vector<1x64xf32>
    %95 = tpu.matmul %93, %58, %cst_21 {dimension_numbers = #tpu.dot_dimension_numbers<[1], [0], [0], [1], [0, 0, 1, 1], [], []>} : vector<1x64xf32>, vector<64x64xf32>, vector<1x64xf32> -> vector<1x64xf32>
    %96 = arith.addf %94, %95 : vector<1x64xf32>
    %97 = math.tanh %96 : vector<1x64xf32>
    %98 = vector.extract_strided_slice %72 {offsets = [6, 0], sizes = [1, 64], strides = [1, 1]} : vector<8x64xf32> to vector<1x64xf32>
    %cst_22 = arith.constant dense<0.000000e+00> : vector<1x64xf32>
    %99 = tpu.matmul %97, %58, %cst_22 {dimension_numbers = #tpu.dot_dimension_numbers<[1], [0], [0], [1], [0, 0, 1, 1], [], []>} : vector<1x64xf32>, vector<64x64xf32>, vector<1x64xf32> -> vector<1x64xf32>
    %100 = arith.addf %98, %99 : vector<1x64xf32>
    %101 = math.tanh %100 : vector<1x64xf32>
    %102 = vector.extract_strided_slice %72 {offsets = [7, 0], sizes = [1, 64], strides = [1, 1]} : vector<8x64xf32> to vector<1x64xf32>
    %cst_23 = arith.constant dense<0.000000e+00> : vector<1x64xf32>
    %103 = tpu.matmul %101, %58, %cst_23 {dimension_numbers = #tpu.dot_dimension_numbers<[1], [0], [0], [1], [0, 0, 1, 1], [], []>} : vector<1x64xf32>, vector<64x64xf32>, vector<1x64xf32> -> vector<1x64xf32>
    %104 = arith.addf %102, %103 : vector<1x64xf32>
    %105 = math.tanh %104 : vector<1x64xf32>
    %106 = tpu.concatenate %77, %81, %85, %89, %93, %97, %101, %105 in 0 : vector<1x64xf32>, vector<1x64xf32>, vector<1x64xf32>, vector<1x64xf32>, vector<1x64xf32>, vector<1x64xf32>, vector<1x64xf32>, vector<1x64xf32> -> vector<8x64xf32>
    %107 = tpu.concatenate %105, %101, %97, %93, %89, %85, %81, %77 in 0 : vector<1x64xf32>, vector<1x64xf32>, vector<1x64xf32>, vector<1x64xf32>, vector<1x64xf32>, vector<1x64xf32>, vector<1x64xf32>, vector<1x64xf32> -> vector<8x64xf32>
    %108 = arith.select %3, %106, %107 : vector<8x64xi1>, vector<8x64xf32>
    %c216 = arith.constant 216 : index
    %c0_24 = arith.constant 0 : index
    %109 = vector.load %arg1[%c216, %c0_24] : memref<408x64xf32, #tpu.memory_space<vmem>>, vector<64x64xf32>
    %c280 = arith.constant 280 : index
    %c0_25 = arith.constant 0 : index
    %110 = vector.load %arg1[%c280, %c0_25] : memref<408x64xf32, #tpu.memory_space<vmem>>, vector<64x64xf32>
    %111 = vector.extract_strided_slice %0 {offsets = [2, 0], sizes = [1, 64], strides = [1, 1]} : vector<8x64xf32> to vector<1x64xf32>
    %cst_26 = arith.constant dense<0.000000e+00> : vector<8x64xf32>
    %112 = tpu.matmul %108, %109, %cst_26 {dimension_numbers = #tpu.dot_dimension_numbers<[1], [0], [0], [1], [0, 0, 1, 1], [], []>} : vector<8x64xf32>, vector<64x64xf32>, vector<8x64xf32> -> vector<8x64xf32>
    %113 = vector.broadcast %111 : vector<1x64xf32> to vector<8x64xf32>
    %114 = arith.addf %112, %113 : vector<8x64xf32>
    %115 = vector.extract_strided_slice %114 {offsets = [7, 0], sizes = [1, 64], strides = [1, 1]} : vector<8x64xf32> to vector<1x64xf32>
    %116 = vector.extract_strided_slice %114 {offsets = [6, 0], sizes = [1, 64], strides = [1, 1]} : vector<8x64xf32> to vector<1x64xf32>
    %117 = vector.extract_strided_slice %114 {offsets = [5, 0], sizes = [1, 64], strides = [1, 1]} : vector<8x64xf32> to vector<1x64xf32>
    %118 = vector.extract_strided_slice %114 {offsets = [4, 0], sizes = [1, 64], strides = [1, 1]} : vector<8x64xf32> to vector<1x64xf32>
    %119 = vector.extract_strided_slice %114 {offsets = [3, 0], sizes = [1, 64], strides = [1, 1]} : vector<8x64xf32> to vector<1x64xf32>
    %120 = vector.extract_strided_slice %114 {offsets = [2, 0], sizes = [1, 64], strides = [1, 1]} : vector<8x64xf32> to vector<1x64xf32>
    %121 = vector.extract_strided_slice %114 {offsets = [1, 0], sizes = [1, 64], strides = [1, 1]} : vector<8x64xf32> to vector<1x64xf32>
    %122 = vector.extract_strided_slice %114 {offsets = [0, 0], sizes = [1, 64], strides = [1, 1]} : vector<8x64xf32> to vector<1x64xf32>
    %123 = tpu.concatenate %115, %116, %117, %118, %119, %120, %121, %122 in 0 : vector<1x64xf32>, vector<1x64xf32>, vector<1x64xf32>, vector<1x64xf32>, vector<1x64xf32>, vector<1x64xf32>, vector<1x64xf32>, vector<1x64xf32> -> vector<8x64xf32>
    %124 = arith.select %3, %114, %123 : vector<8x64xi1>, vector<8x64xf32>
    %125 = vector.extract_strided_slice %0 {offsets = [5, 0], sizes = [1, 64], strides = [1, 1]} : vector<8x64xf32> to vector<1x64xf32>
    %126 = vector.extract_strided_slice %124 {offsets = [0, 0], sizes = [1, 64], strides = [1, 1]} : vector<8x64xf32> to vector<1x64xf32>
    %cst_27 = arith.constant dense<0.000000e+00> : vector<1x64xf32>
    %127 = tpu.matmul %125, %110, %cst_27 {dimension_numbers = #tpu.dot_dimension_numbers<[1], [0], [0], [1], [0, 0, 1, 1], [], []>} : vector<1x64xf32>, vector<64x64xf32>, vector<1x64xf32> -> vector<1x64xf32>
    %128 = arith.addf %126, %127 : vector<1x64xf32>
    %129 = math.tanh %128 : vector<1x64xf32>
    %130 = vector.extract_strided_slice %124 {offsets = [1, 0], sizes = [1, 64], strides = [1, 1]} : vector<8x64xf32> to vector<1x64xf32>
    %cst_28 = arith.constant dense<0.000000e+00> : vector<1x64xf32>
    %131 = tpu.matmul %129, %110, %cst_28 {dimension_numbers = #tpu.dot_dimension_numbers<[1], [0], [0], [1], [0, 0, 1, 1], [], []>} : vector<1x64xf32>, vector<64x64xf32>, vector<1x64xf32> -> vector<1x64xf32>
    %132 = arith.addf %130, %131 : vector<1x64xf32>
    %133 = math.tanh %132 : vector<1x64xf32>
    %134 = vector.extract_strided_slice %124 {offsets = [2, 0], sizes = [1, 64], strides = [1, 1]} : vector<8x64xf32> to vector<1x64xf32>
    %cst_29 = arith.constant dense<0.000000e+00> : vector<1x64xf32>
    %135 = tpu.matmul %133, %110, %cst_29 {dimension_numbers = #tpu.dot_dimension_numbers<[1], [0], [0], [1], [0, 0, 1, 1], [], []>} : vector<1x64xf32>, vector<64x64xf32>, vector<1x64xf32> -> vector<1x64xf32>
    %136 = arith.addf %134, %135 : vector<1x64xf32>
    %137 = math.tanh %136 : vector<1x64xf32>
    %138 = vector.extract_strided_slice %124 {offsets = [3, 0], sizes = [1, 64], strides = [1, 1]} : vector<8x64xf32> to vector<1x64xf32>
    %cst_30 = arith.constant dense<0.000000e+00> : vector<1x64xf32>
    %139 = tpu.matmul %137, %110, %cst_30 {dimension_numbers = #tpu.dot_dimension_numbers<[1], [0], [0], [1], [0, 0, 1, 1], [], []>} : vector<1x64xf32>, vector<64x64xf32>, vector<1x64xf32> -> vector<1x64xf32>
    %140 = arith.addf %138, %139 : vector<1x64xf32>
    %141 = math.tanh %140 : vector<1x64xf32>
    %142 = vector.extract_strided_slice %124 {offsets = [4, 0], sizes = [1, 64], strides = [1, 1]} : vector<8x64xf32> to vector<1x64xf32>
    %cst_31 = arith.constant dense<0.000000e+00> : vector<1x64xf32>
    %143 = tpu.matmul %141, %110, %cst_31 {dimension_numbers = #tpu.dot_dimension_numbers<[1], [0], [0], [1], [0, 0, 1, 1], [], []>} : vector<1x64xf32>, vector<64x64xf32>, vector<1x64xf32> -> vector<1x64xf32>
    %144 = arith.addf %142, %143 : vector<1x64xf32>
    %145 = math.tanh %144 : vector<1x64xf32>
    %146 = vector.extract_strided_slice %124 {offsets = [5, 0], sizes = [1, 64], strides = [1, 1]} : vector<8x64xf32> to vector<1x64xf32>
    %cst_32 = arith.constant dense<0.000000e+00> : vector<1x64xf32>
    %147 = tpu.matmul %145, %110, %cst_32 {dimension_numbers = #tpu.dot_dimension_numbers<[1], [0], [0], [1], [0, 0, 1, 1], [], []>} : vector<1x64xf32>, vector<64x64xf32>, vector<1x64xf32> -> vector<1x64xf32>
    %148 = arith.addf %146, %147 : vector<1x64xf32>
    %149 = math.tanh %148 : vector<1x64xf32>
    %150 = vector.extract_strided_slice %124 {offsets = [6, 0], sizes = [1, 64], strides = [1, 1]} : vector<8x64xf32> to vector<1x64xf32>
    %cst_33 = arith.constant dense<0.000000e+00> : vector<1x64xf32>
    %151 = tpu.matmul %149, %110, %cst_33 {dimension_numbers = #tpu.dot_dimension_numbers<[1], [0], [0], [1], [0, 0, 1, 1], [], []>} : vector<1x64xf32>, vector<64x64xf32>, vector<1x64xf32> -> vector<1x64xf32>
    %152 = arith.addf %150, %151 : vector<1x64xf32>
    %153 = math.tanh %152 : vector<1x64xf32>
    %154 = vector.extract_strided_slice %124 {offsets = [7, 0], sizes = [1, 64], strides = [1, 1]} : vector<8x64xf32> to vector<1x64xf32>
    %cst_34 = arith.constant dense<0.000000e+00> : vector<1x64xf32>
    %155 = tpu.matmul %153, %110, %cst_34 {dimension_numbers = #tpu.dot_dimension_numbers<[1], [0], [0], [1], [0, 0, 1, 1], [], []>} : vector<1x64xf32>, vector<64x64xf32>, vector<1x64xf32> -> vector<1x64xf32>
    %156 = arith.addf %154, %155 : vector<1x64xf32>
    %157 = math.tanh %156 : vector<1x64xf32>
    %158 = tpu.concatenate %129, %133, %137, %141, %145, %149, %153, %157 in 0 : vector<1x64xf32>, vector<1x64xf32>, vector<1x64xf32>, vector<1x64xf32>, vector<1x64xf32>, vector<1x64xf32>, vector<1x64xf32>, vector<1x64xf32> -> vector<8x64xf32>
    %159 = tpu.concatenate %157, %153, %149, %145, %141, %137, %133, %129 in 0 : vector<1x64xf32>, vector<1x64xf32>, vector<1x64xf32>, vector<1x64xf32>, vector<1x64xf32>, vector<1x64xf32>, vector<1x64xf32>, vector<1x64xf32> -> vector<8x64xf32>
    %160 = arith.select %3, %158, %159 : vector<8x64xi1>, vector<8x64xf32>
    %161 = tpu.concatenate %53, %105, %157 in 0 : vector<1x64xf32>, vector<1x64xf32>, vector<1x64xf32> -> vector<3x64xf32>
    %c0_35 = arith.constant 0 : index
    %c0_36 = arith.constant 0 : index
    %162 = vector.load %arg3[%c0_35, %c0_36] : memref<3x64xf32, #tpu.memory_space<vmem>>, vector<3x64xf32>
    tpu.vector_store %arg3[%c0_35, %c0_36], %161 {strides = array<i32>} : memref<3x64xf32, #tpu.memory_space<vmem>>, vector<3x64xf32>,
    %c344 = arith.constant 344 : index
    %c0_37 = arith.constant 0 : index
    %163 = vector.load %arg1[%c344, %c0_37] : memref<408x64xf32, #tpu.memory_space<vmem>>, vector<64x64xf32>
    %cst_38 = arith.constant dense<0.000000e+00> : vector<8x64xf32>
    %164 = tpu.matmul %160, %163, %cst_38 {dimension_numbers = #tpu.dot_dimension_numbers<[1], [0], [0], [1], [0, 0, 1, 1], [], []>} : vector<8x64xf32>, vector<64x64xf32>, vector<8x64xf32> -> vector<8x64xf32>
    %165 = vector.extract_strided_slice %164 {offsets = [0, 0], sizes = [8, 8], strides = [1, 1]} : vector<8x64xf32> to vector<8x8xf32>
    %166 = vector.extract_strided_slice %0 {offsets = [6, 0], sizes = [1, 8], strides = [1, 1]} : vector<8x64xf32> to vector<1x8xf32>
    %167 = vector.broadcast %166 : vector<1x8xf32> to vector<8x8xf32>
    %168 = arith.addf %165, %167 : vector<8x8xf32>
    %c0_39 = arith.constant 0 : index
    %c0_40 = arith.constant 0 : index
    %169 = vector.load %arg2[%c0_39, %c0_40] : memref<8x8xf32, #tpu.memory_space<vmem>>, vector<8x8xf32>
    tpu.vector_store %arg2[%c0_39, %c0_40], %168 {strides = array<i32>} : memref<8x8xf32, #tpu.memory_space<vmem>>, vector<8x8xf32>,
    return
  }
}

</mosaic_0001>

<bundles_post_ra>
// kernel: _lambda_.1
= control target key start
LH: loop header
LB: loop body
LE: loop exit
PB: predicated region body
PF: predicated region fallthrough
CT: control target
= control target key end

     0   :  { %v3312_v2 = vmov 0.0   ;;  %vm33_vm0 = vcmask 130048   ;;  %vm3313_vm1 = vmmov 0   ;;  %s4282_s0 = inlined_call_operand.vmem [shape: f32[8,16], index: 0, kind: input, shape index: {}]   ;;  %s4283_s1 = inlined_call_operand.vmem [shape: f32[408,64], index: 1, kind: input, shape index: {}]   ;;  %s4284_s2 = inlined_call_operand.hbm [shape: f32[8,8], index: 2, kind: output, shape index: {0}]   ;;  %s4285_s3 = inlined_call_operand.vmem [shape: f32[3,64], index: 3, kind: output, shape index: {1}]  }
   0x1   :  { %v20_v0 = vld [vmem:[%s4283_s1 + $0x10] sm:$0xff]  ;;  %2718 = vmatprep.subr.mxu0 %v3312_v2  ;;  %2725 = vmatprep.subr.mxu1 %v3312_v2  ;;  %v19_v3 = vld [vmem:[%s4283_s1 + $0x8] sm:$0xff]  ;;  %v18_v5 = vld [vmem:[%s4282_s0] sm:$0xff] }
   0x2   :  { %v3341_v1 = vld [vmem:[%s4283_s1 + $0x50] sm:$0xff]  ;;  %2719 = vmatpush3.msra.mxu0 %v20_v0  ;;  %v3352_v4 = vld [vmem:[%s4283_s1 + $0x48] sm:$0xff]  ;;  %2722 = vmatprep.mubr.msk.f32.mxu0 %vm3313_vm1, %v3312_v2  ;;  %v3364_v6 = vld [vmem:[%s4283_s1 + $0x40] sm:$0xff] }
   0x3   :  { %2726 = vmatpush3.msra.mxu1 %v3341_v1  ;;  %2720 = vmatprep.subr.mxu0 %v3312_v2 }
   0x4   :  { %2727 = vmatprep.subr.mxu1 %v3312_v2  ;;  %2721 = vmatpush3.msra.mxu0 %v19_v3 }
   0x5   :  { %9 = vsyncpa [#allocation3], 0  ;;  %2728 = vmatpush3.msra.mxu1 %v3352_v4  ;;  %2723 = vmatmul.mubr.msk.f32.vlgmr.msra.gmra.mxu0 %vm33_vm0, %v18_v5  ;;  %v3371_v7 = vld [vmem:[%s4283_s1 + $0x38] sm:$0xff]  ;;  %v3381_v8 = vld [vmem:[%s4283_s1 + $0x30] sm:$0xff]  ;;  %vm133_vm2 = vcmask 523264   ;;  %v15_v14 = vlaneseq  ;;  %vm116_vm3 = vcmask 1040384  }
   0x6   :  { %2729 = vmatprep.subr.mxu1 %v3312_v2  ;;  %2741 = vmatprep.mubr.msk.f32.mxu1 %vm3313_vm1, %v3312_v2  ;;  %v3390_v9 = vld [vmem:[%s4283_s1 + $0x28] sm:$0xff]  ;;  %v3397_v10 = vld [vmem:[%s4283_s1] sm:$0xff]  ;;  %v3413_v12 = vld [vmem:[%s4283_s1 + $0x18] sm:$0xff]  ;;  %vm118_vm4 = vcmask 1041408   ;;  %vm120_vm5 = vcmask 1042432   ;;  %vm122_vm6 = vcmask 1043456  }
   0x7   :  { %2730 = vmatpush3.msra.mxu1 %v3364_v6  ;;  %2744 = vmatprep.subr.mxu0 %v3312_v2  ;;  %v3404_v11 = vld [vmem:[%s4283_s1 + $0x20] sm:$0xff]  ;;  %v132_v13 = vrot.slane %v3397_v10, 3  ;;  %v3451_v15 = vshrl.u32 %v15_v14, 7  ;;  %v3455_v24 = vand.u32 127, %v15_v14  ;;  %vm124_vm7 = vcmask 1044480  }
   0x8   :  { %2731 = vmatprep.subr.mxu1 %v3312_v2  ;;  %2745 = vmatpush3.msra.mxu0 %v3341_v1  ;;  %vm126_vm8 = vcmask 1045504   ;;  %vm128_vm9 = vcmask 1046528   ;;  %vm2336_vm11 = vcmask 518144   ;;  %vm2424_vm12 = vcmask 64512  }
   0x9   :  { %2732 = vmatpush3.msra.mxu1 %v3371_v7  ;;  %2746 = vmatprep.subr.mxu0 %v3312_v2  ;;  %v31_v16 = vsub.s32 0, %v3451_v15  ;;  %vm17_vm10 = vcmp.lt.s32.totalorder %v3455_v24, 32 }
   0xa   :  { %2733 = vmatprep.subr.mxu1 %v3312_v2  ;;  %2747 = vmatpush3.msra.mxu0 %v3352_v4 }
   0xb   :  { %2734 = vmatpush3.msra.mxu1 %v3381_v8  ;;  %2748 = vmatprep.subr.mxu0 %v3312_v2  ;;  %v32_v17 = vrot.slane %v3397_v10, %v31_v16 }
   0xc   :  { %2735 = vmatprep.subr.mxu1 %v3312_v2  ;;  %2749 = vmatpush3.msra.mxu0 %v3364_v6 }
   0xd   :  { %2736 = vmatpush3.msra.mxu1 %v3390_v9  ;;  %2750 = vmatprep.subr.mxu0 %v3312_v2 }
   0xe   :  { %2737 = vmatprep.subr.mxu1 %v3312_v2  ;;  %2751 = vmatpush3.msra.mxu0 %v3371_v7 }
   0xf   :  { %2738 = vmatpush3.msra.mxu1 %v3404_v11  ;;  %2752 = vmatprep.subr.mxu0 %v3312_v2 }
  0x10   :  { %2739 = vmatprep.subr.mxu1 %v3312_v2  ;;  %2753 = vmatpush3.msra.mxu0 %v3381_v8 }
  0x11   :  { %2740 = vmatpush3.msra.mxu1 %v3413_v12  ;;  %2754 = vmatprep.subr.mxu0 %v3312_v2 }
  0x12   :  { %2742 = vmatmul.mubr.msk.f32.vlgmr.msra.gmra.mxu1 %vm133_vm2, %v132_v13  ;;  %2755 = vmatpush3.msra.mxu0 %v3390_v9 }
  0x13   :  { %2756 = vmatprep.subr.mxu0 %v3312_v2  ;;  %2760 = vmatprep.mubr.msk.f32.mxu0 %vm3313_vm1, %v3312_v2 }
  0x14   :  { %2757 = vmatpush3.msra.mxu0 %v3404_v11  ;;  %2763 = vmatprep.subr.mxu1 %v3312_v2 }
  0x15   :  { %2758 = vmatprep.subr.mxu0 %v3312_v2  ;;  %2764 = vmatpush3.msra.mxu1 %v3341_v1 }
  0x16   :  { %2759 = vmatpush3.msra.mxu0 %v3413_v12  ;;  %2765 = vmatprep.subr.mxu1 %v3312_v2 }
  0x17   :  { %2766 = vmatpush3.msra.mxu1 %v3352_v4  ;;  %2779 = vmatprep.mubr.msk.f32.mxu1 %vm3313_vm1, %v3312_v2 }
  0x18   :  { %2767 = vmatprep.subr.mxu1 %v3312_v2  ;;  %2782 = vmatprep.subr.mxu0 %v3312_v2 }
  0x19   :  { %2768 = vmatpush3.msra.mxu1 %v3364_v6 }
  0x1a   :  { %2769 = vmatprep.subr.mxu1 %v3312_v2 }
  0x1b   :  { %2770 = vmatpush3.msra.mxu1 %v3371_v7 }
  0x1c   :  { %2771 = vmatprep.subr.mxu1 %v3312_v2 }
  0x1d   :  { %2772 = vmatpush3.msra.mxu1 %v3381_v8 }
  0x1e   :  { %2773 = vmatprep.subr.mxu1 %v3312_v2 }
  0x1f   :  { %2774 = vmatpush3.msra.mxu1 %v3390_v9 }
  0x20   :  { %2775 = vmatprep.subr.mxu1 %v3312_v2 }
  0x21   :  { %2776 = vmatpush3.msra.mxu1 %v3404_v11 }
  0x22   :  { %2777 = vmatprep.subr.mxu1 %v3312_v2 }
  0x23   :  { %2778 = vmatpush3.msra.mxu1 %v3413_v12 }
  0x24   :  { %2801 = vmatprep.subr.mxu1 %v3312_v2 }
  0xc5   :  { %v103_v18 = vpop.f32.mrf.mxu0 }
  0xc6   :  { %v104_v19 = vadd.f32 %v103_v18, %v32_v17 }
  0xc7   :  { %v2724_v20 = vpop.f32.mrf.mxu0 }
  0xc8   :  { %v108_v21 = vrot.slane %v104_v19, 7  ;;  %v110_v22 = vrot.slane %v104_v19, 5  ;;  %v112_v23 = vrot.slane %v104_v19, 3  ;;  %v114_v25 = vrot.slane %v104_v19, 1  ;;  %v798_v20 = vld [vmem:[%s4283_s1 + $0x88] sm:$0xff] }
  0xca   :  { %v117_v26 = vsel %vm116_vm3, %v108_v21, %v110_v22 }
  0xcb   :  { %v119_v27 = vsel %vm118_vm4, %v117_v26, %v112_v23  ;;  %v3639_v26 = vld [vmem:[%s4283_s1 + $0xc8] sm:$0xff] }
  0xcc   :  { %v121_v28 = vsel %vm120_vm5, %v119_v27, %v114_v25  ;;  %v794_v27 = vld [vmem:[%s4283_s1 + $0x68] sm:$0xff] }
  0xcd   :  { %v123_v29 = vsel %vm122_vm6, %v121_v28, %v108_v21  ;;  %v797_v21 = vld [vmem:[%s4283_s1 + $0x80] sm:$0xff] }
  0xce   :  { %v125_v30 = vsel %vm124_vm7, %v123_v29, %v110_v22  ;;  %v796_v22 = vld [vmem:[%s4283_s1 + $0x78] sm:$0xff]  ;;  %v3650_v28 = vld [vmem:[%s4283_s1 + $0xc0] sm:$0xff] }
  0xcf   :  { %v127_v31 = vsel %vm126_vm8, %v125_v30, %v112_v23  ;;  %v795_v23 = vld [vmem:[%s4283_s1 + $0x70] sm:$0xff]  ;;  %v793_v29 = vld [vmem:[%s4283_s1 + $0x60] sm:$0xff]  ;;  %v792_v30 = vld [vmem:[%s4283_s1 + $0x58] sm:$0xff] }
  0xd0   :  { %v129_v32 = vsel %vm128_vm9, %v127_v31, %v114_v25  ;;  %v3634_v25 = vld [vmem:[%s4283_s1 + $0xd0] sm:$0xff]  ;;  %v3668_v31 = vld [vmem:[%s4283_s1 + $0xb8] sm:$0xff] }
  0xd1   :  { %v3467_v33 = vsel %vm17_vm10, %v104_v19, %v129_v32  ;;  %v799_v19 = vld [vmem:[%s4283_s1 + $0x90] sm:$0xff] }
  0xd2   :  { %v202_v34 = vpop.f32.mrf.mxu1  ;;  %v3673_v32 = vld [vmem:[%s4283_s1 + $0xb0] sm:$0xff] }
  0xd3   :  { %v206_v35 = vadd.f32 %v202_v34, %v3467_v33  ;;  %v3681_v34 = vld [vmem:[%s4283_s1 + $0xa8] sm:$0xff] }
  0xd4   :  { %v2743_v36 = vpop.f32.mrf.mxu1 }
  0xd5   :  { %3241 = vtanh.f32 %v206_v35  ;;  %v3688_v35 = vld [vmem:[%s4283_s1 + $0xa0] sm:$0xff]  ;;  %v3695_v36 = vld [vmem:[%s4283_s1 + $0x98] sm:$0xff] }
  0xe2   :  { %v3470_v37 = vpop.eup %3241 }
  0xe3   :  { %2761 = vmatmul.mubr.msk.f32.vlgmr.msra.gmra.mxu0 %vm133_vm2, %v3470_v37 }
  0xe4   :  { %2783 = vmatpush3.msra.mxu0 %v3341_v1  ;;  %2798 = vmatprep.mubr.msk.f32.mxu0 %vm3313_vm1, %v3312_v2 }
  0xe5   :  { %2784 = vmatprep.subr.mxu0 %v3312_v2 }
  0xe6   :  { %2785 = vmatpush3.msra.mxu0 %v3352_v4 }
  0xe7   :  { %2786 = vmatprep.subr.mxu0 %v3312_v2 }
  0xe8   :  { %2787 = vmatpush3.msra.mxu0 %v3364_v6 }
  0xe9   :  { %2788 = vmatprep.subr.mxu0 %v3312_v2 }
  0xea   :  { %2789 = vmatpush3.msra.mxu0 %v3371_v7 }
  0xeb   :  { %2790 = vmatprep.subr.mxu0 %v3312_v2 }
  0xec   :  { %2791 = vmatpush3.msra.mxu0 %v3381_v8 }
  0xed   :  { %2792 = vmatprep.subr.mxu0 %v3312_v2 }
  0xee   :  { %2793 = vmatpush3.msra.mxu0 %v3390_v9 }
  0xef   :  { %2794 = vmatprep.subr.mxu0 %v3312_v2 }
  0xf0   :  { %2795 = vmatpush3.msra.mxu0 %v3404_v11 }
  0xf1   :  { %2796 = vmatprep.subr.mxu0 %v3312_v2 }
  0xf2   :  { %2797 = vmatpush3.msra.mxu0 %v3413_v12 }
  0xf3   :  { %2820 = vmatprep.subr.mxu0 %v3312_v2 }
 0x1a3   :  { %v277_v38 = vpop.f32.mrf.mxu0 }
 0x1a4   :  { %v282_v39 = vrot.slane %v277_v38, 7  ;;  %v902_v38 = vrot.slane %v3397_v10, 4 }
 0x1a5   :  { %v2762_v40 = vpop.f32.mrf.mxu0 }
 0x1a6   :  { %v284_v41 = vadd.f32 %v282_v39, %v3467_v33 }
 0x1a8   :  { %3243 = vtanh.f32 %v284_v41 }
 0x1b5   :  { %v3493_v42 = vpop.eup %3243 }
 0x1b6   :  { %v287_v43 = vrot.slane %v3493_v42, 1  ;;  %v760_v49 = vsel %vm116_vm3, %v3470_v37, %v3493_v42 }
 0x1b8   :  { %2780 = vmatmul.mubr.msk.f32.vlgmr.msra.gmra.mxu1 %vm133_vm2, %v287_v43 }
 0x1b9   :  { %2802 = vmatpush3.msra.mxu1 %v3341_v1  ;;  %2817 = vmatprep.mubr.msk.f32.mxu1 %vm3313_vm1, %v3312_v2 }
 0x1ba   :  { %2803 = vmatprep.subr.mxu1 %v3312_v2 }
 0x1bb   :  { %2804 = vmatpush3.msra.mxu1 %v3352_v4 }
 0x1bc   :  { %2805 = vmatprep.subr.mxu1 %v3312_v2 }
 0x1bd   :  { %2806 = vmatpush3.msra.mxu1 %v3364_v6 }
 0x1be   :  { %2807 = vmatprep.subr.mxu1 %v3312_v2 }
 0x1bf   :  { %2808 = vmatpush3.msra.mxu1 %v3371_v7 }
 0x1c0   :  { %2809 = vmatprep.subr.mxu1 %v3312_v2 }
 0x1c1   :  { %2810 = vmatpush3.msra.mxu1 %v3381_v8 }
 0x1c2   :  { %2811 = vmatprep.subr.mxu1 %v3312_v2 }
 0x1c3   :  { %2812 = vmatpush3.msra.mxu1 %v3390_v9 }
 0x1c4   :  { %2813 = vmatprep.subr.mxu1 %v3312_v2 }
 0x1c5   :  { %2814 = vmatpush3.msra.mxu1 %v3404_v11 }
 0x1c6   :  { %2815 = vmatprep.subr.mxu1 %v3312_v2 }
 0x1c7   :  { %2816 = vmatpush3.msra.mxu1 %v3413_v12 }
 0x1c8   :  { %2839 = vmatprep.subr.mxu1 %v3312_v2 }
 0x278   :  { %v356_v44 = vpop.f32.mrf.mxu1 }
 0x279   :  { %v361_v45 = vrot.slane %v356_v44, 6 }
 0x27a   :  { %v2781_v46 = vpop.f32.mrf.mxu1 }
 0x27b   :  { %v363_v47 = vadd.f32 %v361_v45, %v3467_v33 }
 0x27d   :  { %3245 = vtanh.f32 %v363_v47 }
 0x28a   :  { %v3516_v48 = vpop.eup %3245 }
 0x28b   :  { %v366_v50 = vrot.slane %v3516_v48, 2  ;;  %v761_v51 = vsel %vm118_vm4, %v760_v49, %v3516_v48 }
 0x28d   :  { %2799 = vmatmul.mubr.msk.f32.vlgmr.msra.gmra.mxu0 %vm133_vm2, %v366_v50 }
 0x28e   :  { %2821 = vmatpush3.msra.mxu0 %v3341_v1  ;;  %2836 = vmatprep.mubr.msk.f32.mxu0 %vm3313_vm1, %v3312_v2 }
 0x28f   :  { %2822 = vmatprep.subr.mxu0 %v3312_v2 }
 0x290   :  { %2823 = vmatpush3.msra.mxu0 %v3352_v4 }
 0x291   :  { %2824 = vmatprep.subr.mxu0 %v3312_v2 }
 0x292   :  { %2825 = vmatpush3.msra.mxu0 %v3364_v6 }
 0x293   :  { %2826 = vmatprep.subr.mxu0 %v3312_v2 }
 0x294   :  { %2827 = vmatpush3.msra.mxu0 %v3371_v7 }
 0x295   :  { %2828 = vmatprep.subr.mxu0 %v3312_v2 }
 0x296   :  { %2829 = vmatpush3.msra.mxu0 %v3381_v8 }
 0x297   :  { %2830 = vmatprep.subr.mxu0 %v3312_v2 }
 0x298   :  { %2831 = vmatpush3.msra.mxu0 %v3390_v9 }
 0x299   :  { %2832 = vmatprep.subr.mxu0 %v3312_v2 }
 0x29a   :  { %2833 = vmatpush3.msra.mxu0 %v3404_v11 }
 0x29b   :  { %2834 = vmatprep.subr.mxu0 %v3312_v2 }
 0x29c   :  { %2835 = vmatpush3.msra.mxu0 %v3413_v12 }
 0x29d   :  { %2858 = vmatprep.subr.mxu0 %v3312_v2 }
 0x34d   :  { %v435_v52 = vpop.f32.mrf.mxu0 }
 0x34e   :  { %v440_v53 = vrot.slane %v435_v52, 5 }
 0x34f   :  { %v2800_v54 = vpop.f32.mrf.mxu0 }
 0x350   :  { %v442_v55 = vadd.f32 %v440_v53, %v3467_v33  ;;  %v780_v54 = vrot.slane %v3493_v42, 3 }
 0x352   :  { %3247 = vtanh.f32 %v442_v55 }
 0x35f   :  { %v3544_v56 = vpop.eup %3247 }
 0x360   :  { %v445_v57 = vrot.slane %v3544_v56, 3  ;;  %v762_v58 = vsel %vm120_vm5, %v761_v51, %v3544_v56  ;;  %v776_v51 = vrot.slane %v3544_v56, 7 }
 0x362   :  { %2818 = vmatmul.mubr.msk.f32.vlgmr.msra.gmra.mxu1 %vm133_vm2, %v445_v57  ;;  %v782_v57 = vrot.slane %v3470_v37, 1 }
 0x363   :  { %2840 = vmatpush3.msra.mxu1 %v3341_v1  ;;  %2855 = vmatprep.mubr.msk.f32.mxu1 %vm3313_vm1, %v3312_v2 }
 0x364   :  { %2841 = vmatprep.subr.mxu1 %v3312_v2 }
 0x365   :  { %2842 = vmatpush3.msra.mxu1 %v3352_v4 }
 0x366   :  { %2843 = vmatprep.subr.mxu1 %v3312_v2 }
 0x367   :  { %2844 = vmatpush3.msra.mxu1 %v3364_v6 }
 0x368   :  { %2845 = vmatprep.subr.mxu1 %v3312_v2 }
 0x369   :  { %2846 = vmatpush3.msra.mxu1 %v3371_v7 }
 0x36a   :  { %2847 = vmatprep.subr.mxu1 %v3312_v2 }
 0x36b   :  { %2848 = vmatpush3.msra.mxu1 %v3381_v8 }
 0x36c   :  { %2849 = vmatprep.subr.mxu1 %v3312_v2 }
 0x36d   :  { %2850 = vmatpush3.msra.mxu1 %v3390_v9 }
 0x36e   :  { %2851 = vmatprep.subr.mxu1 %v3312_v2 }
 0x36f   :  { %2852 = vmatpush3.msra.mxu1 %v3404_v11 }
 0x370   :  { %2853 = vmatprep.subr.mxu1 %v3312_v2 }
 0x371   :  { %2854 = vmatpush3.msra.mxu1 %v3413_v12 }
 0x372   :  { %2877 = vmatprep.subr.mxu1 %v3312_v2 }
 0x422   :  { %v514_v59 = vpop.f32.mrf.mxu1 }
 0x423   :  { %v519_v60 = vrot.slane %v514_v59, 4 }
 0x424   :  { %v2819_v61 = vpop.f32.mrf.mxu1 }
 0x425   :  { %v521_v62 = vadd.f32 %v519_v60, %v3467_v33  ;;  %v810_v61 = vsub.s32 1, %v3451_v15 }
 0x427   :  { %3249 = vtanh.f32 %v521_v62  ;;  %v811_v62 = vrot.slane %v3397_v10, %v810_v61 }
 0x434   :  { %v3569_v63 = vpop.eup %3249 }
 0x435   :  { %v524_v0 = vrot.slane %v3569_v63, 4  ;;  %v763_v3 = vsel %vm122_vm6, %v762_v58, %v3569_v63  ;;  %v774_v49 = vrot.slane %v3569_v63, 1 }
 0x437   :  { %2837 = vmatmul.mubr.msk.f32.vlgmr.msra.gmra.mxu0 %vm133_vm2, %v524_v0 }
 0x438   :  { %2859 = vmatpush3.msra.mxu0 %v3341_v1  ;;  %2874 = vmatprep.mubr.msk.f32.mxu0 %vm3313_vm1, %v3312_v2 }
 0x439   :  { %2860 = vmatprep.subr.mxu0 %v3312_v2 }
 0x43a   :  { %2861 = vmatpush3.msra.mxu0 %v3352_v4 }
 0x43b   :  { %2862 = vmatprep.subr.mxu0 %v3312_v2 }
 0x43c   :  { %2863 = vmatpush3.msra.mxu0 %v3364_v6 }
 0x43d   :  { %2864 = vmatprep.subr.mxu0 %v3312_v2 }
 0x43e   :  { %2865 = vmatpush3.msra.mxu0 %v3371_v7 }
 0x43f   :  { %2866 = vmatprep.subr.mxu0 %v3312_v2 }
 0x440   :  { %2867 = vmatpush3.msra.mxu0 %v3381_v8 }
 0x441   :  { %2868 = vmatprep.subr.mxu0 %v3312_v2 }
 0x442   :  { %2869 = vmatpush3.msra.mxu0 %v3390_v9 }
 0x443   :  { %2870 = vmatprep.subr.mxu0 %v3312_v2 }
 0x444   :  { %2871 = vmatpush3.msra.mxu0 %v3404_v11 }
 0x445   :  { %2872 = vmatprep.subr.mxu0 %v3312_v2 }
 0x446   :  { %2873 = vmatpush3.msra.mxu0 %v3413_v12 }
 0x447   :  { %2896 = vmatprep.subr.mxu0 %v3312_v2 }
 0x4f7   :  { %v593_v1 = vpop.f32.mrf.mxu0 }
 0x4f8   :  { %v598_v4 = vrot.slane %v593_v1, 3 }
 0x4f9   :  { %v2838_v5 = vpop.f32.mrf.mxu0 }
 0x4fa   :  { %v600_v6 = vadd.f32 %v598_v4, %v3467_v33 }
 0x4fc   :  { %3251 = vtanh.f32 %v600_v6 }
 0x509   :  { %v3594_v7 = vpop.eup %3251 }
 0x50a   :  { %v603_v8 = vrot.slane %v3594_v7, 5  ;;  %v764_v9 = vsel %vm124_vm7, %v763_v3, %v3594_v7  ;;  %v772_v47 = vrot.slane %v3594_v7, 3 }
 0x50c   :  { %2856 = vmatmul.mubr.msk.f32.vlgmr.msra.gmra.mxu1 %vm133_vm2, %v603_v8 }
 0x50d   :  { %2893 = vmatprep.mubr.msk.f32.mxu1 %vm3313_vm1, %v3312_v2  ;;  %2878 = vmatpush3.msra.mxu1 %v799_v19 }
 0x50e   :  { %2879 = vmatprep.subr.mxu1 %v3312_v2 }
 0x50f   :  { %2880 = vmatpush3.msra.mxu1 %v798_v20 }
 0x510   :  { %2881 = vmatprep.subr.mxu1 %v3312_v2 }
 0x511   :  { %2882 = vmatpush3.msra.mxu1 %v797_v21 }
 0x512   :  { %2883 = vmatprep.subr.mxu1 %v3312_v2 }
 0x513   :  { %2884 = vmatpush3.msra.mxu1 %v796_v22 }
 0x514   :  { %2885 = vmatprep.subr.mxu1 %v3312_v2 }
 0x515   :  { %2886 = vmatpush3.msra.mxu1 %v795_v23 }
 0x516   :  { %2887 = vmatprep.subr.mxu1 %v3312_v2 }
 0x517   :  { %2888 = vmatpush3.msra.mxu1 %v794_v27 }
 0x518   :  { %2889 = vmatprep.subr.mxu1 %v3312_v2 }
 0x519   :  { %2890 = vmatpush3.msra.mxu1 %v793_v29 }
 0x51a   :  { %2891 = vmatprep.subr.mxu1 %v3312_v2 }
 0x51b   :  { %2892 = vmatpush3.msra.mxu1 %v792_v30 }
 0x51c   :  { %2915 = vmatprep.subr.mxu1 %v3312_v2 }
 0x5cc   :  { %v672_v11 = vpop.f32.mrf.mxu1 }
 0x5cd   :  { %v677_v12 = vrot.slane %v672_v11, 2 }
 0x5ce   :  { %v2857_v13 = vpop.f32.mrf.mxu1 }
 0x5cf   :  { %v679_v14 = vadd.f32 %v677_v12, %v3467_v33 }
 0x5d1   :  { %3253 = vtanh.f32 %v679_v14 }
 0x5de   :  { %v3603_v16 = vpop.eup %3253 }
 0x5df   :  { %v682_v17 = vrot.slane %v3603_v16, 6  ;;  %v3608_v18 = vsel %vm126_vm8, %v764_v9, %v3603_v16  ;;  %v770_v46 = vrot.slane %v3603_v16, 5 }
 0x5e1   :  { %2875 = vmatmul.mubr.msk.f32.vlgmr.msra.gmra.mxu0 %vm133_vm2, %v682_v17 }
 0x5e2   :  { %2912 = vmatprep.mubr.msk.f32.mxu0 %vm3313_vm1, %v3312_v2  ;;  %2897 = vmatpush3.msra.mxu0 %v3634_v25 }
 0x5e3   :  { %2898 = vmatprep.subr.mxu0 %v3312_v2 }
 0x5e4   :  { %2899 = vmatpush3.msra.mxu0 %v3639_v26 }
 0x5e5   :  { %2900 = vmatprep.subr.mxu0 %v3312_v2 }
 0x5e6   :  { %2901 = vmatpush3.msra.mxu0 %v3650_v28 }
 0x5e7   :  { %2902 = vmatprep.subr.mxu0 %v3312_v2 }
 0x5e8   :  { %2903 = vmatpush3.msra.mxu0 %v3668_v31 }
 0x5e9   :  { %2904 = vmatprep.subr.mxu0 %v3312_v2 }
 0x5ea   :  { %2905 = vmatpush3.msra.mxu0 %v3673_v32 }
 0x5eb   :  { %2906 = vmatprep.subr.mxu0 %v3312_v2 }
 0x5ec   :  { %2907 = vmatpush3.msra.mxu0 %v3681_v34 }
 0x5ed   :  { %2908 = vmatprep.subr.mxu0 %v3312_v2 }
 0x5ee   :  { %2909 = vmatpush3.msra.mxu0 %v3688_v35 }
 0x5ef   :  { %2910 = vmatprep.subr.mxu0 %v3312_v2 }
 0x5f0   :  { %2911 = vmatpush3.msra.mxu0 %v3695_v36 }
 0x5f1   :  { %2913 = vmatmul.mubr.msk.f32.vlgmr.msra.gmra.mxu0 %vm133_vm2, %v902_v38  ;;  %2934 = vmatprep.subr.mxu0 %v3312_v2 }
 0x5f2   :  { %2935 = vmatpush3.msra.mxu0 %v3634_v25  ;;  %2950 = vmatprep.mubr.msk.f32.mxu0 %vm3313_vm1, %v3312_v2 }
 0x5f3   :  { %2936 = vmatprep.subr.mxu0 %v3312_v2 }
 0x5f4   :  { %2937 = vmatpush3.msra.mxu0 %v3639_v26 }
 0x5f5   :  { %2938 = vmatprep.subr.mxu0 %v3312_v2 }
 0x5f6   :  { %2939 = vmatpush3.msra.mxu0 %v3650_v28 }
 0x5f7   :  { %2940 = vmatprep.subr.mxu0 %v3312_v2 }
 0x5f8   :  { %2941 = vmatpush3.msra.mxu0 %v3668_v31 }
 0x5f9   :  { %2942 = vmatprep.subr.mxu0 %v3312_v2 }
 0x5fa   :  { %2943 = vmatpush3.msra.mxu0 %v3673_v32 }
 0x5fb   :  { %2944 = vmatprep.subr.mxu0 %v3312_v2 }
 0x5fc   :  { %2945 = vmatpush3.msra.mxu0 %v3681_v34 }
 0x5fd   :  { %2946 = vmatprep.subr.mxu0 %v3312_v2 }
 0x5fe   :  { %2947 = vmatpush3.msra.mxu0 %v3688_v35 }
 0x5ff   :  { %2948 = vmatprep.subr.mxu0 %v3312_v2 }
 0x600   :  { %2949 = vmatpush3.msra.mxu0 %v3695_v36 }
 0x601   :  { %2972 = vmatprep.subr.mxu0 %v3312_v2 }
 0x6a1   :  { %v751_v39 = vpop.f32.mrf.mxu0 }
 0x6a2   :  { %v756_v40 = vrot.slane %v751_v39, 1 }
 0x6a3   :  { %v2876_v41 = vpop.f32.mrf.mxu0 }
 0x6a4   :  { %v758_v43 = vadd.f32 %v756_v40, %v3467_v33  ;;  %v778_v33 = vrot.slane %v3516_v48, 5 }
 0x6a6   :  { %3255 = vtanh.f32 %v758_v43 }
 0x6b1   :  { %v971_v37 = vpop.f32.mrf.mxu0 }
 0x6b3   :  { %v3722_v44 = vpop.eup %3255  ;;  %v2914_v42 = vpop.f32.mrf.mxu0 }
 0x6b4   :  { %v768_v45 = vrot.slane %v3722_v44, 7  ;;  %v766_v56 = vsel %vm128_vm9, %v3608_v18, %v3722_v44 }
 0x6b6   :  { %v784_v50 = vsel %vm116_vm3, %v768_v45, %v770_v46 }
 0x6b7   :  { %v785_v52 = vsel %vm118_vm4, %v784_v50, %v772_v47 }
 0x6b8   :  { %v786_v53 = vsel %vm120_vm5, %v785_v52, %v774_v49 }
 0x6b9   :  { %v787_v55 = vsel %vm122_vm6, %v786_v53, %v776_v51 }
 0x6ba   :  { %v788_v58 = vsel %vm124_vm7, %v787_v55, %v778_v33 }
 0x6bb   :  { %v789_v59 = vsel %vm126_vm8, %v788_v58, %v780_v54 }
 0x6bc   :  { %v790_v60 = vsel %vm128_vm9, %v789_v59, %v782_v57 }
 0x6bd   :  { %v791_v48 = vsel %vm17_vm10, %v766_v56, %v790_v60 }
 0x6be   :  { %2894 = vmatmul.mubr.msk.f32.vlgmr.msra.gmra.mxu1 %vm133_vm2, %v791_v48 }
 0x6bf   :  { %2916 = vmatpush3.msra.mxu1 %v3634_v25  ;;  %2931 = vmatprep.mubr.msk.f32.mxu1 %vm3313_vm1, %v3312_v2 }
 0x6c0   :  { %2917 = vmatprep.subr.mxu1 %v3312_v2 }
 0x6c1   :  { %2918 = vmatpush3.msra.mxu1 %v3639_v26 }
 0x6c2   :  { %2919 = vmatprep.subr.mxu1 %v3312_v2 }
 0x6c3   :  { %2920 = vmatpush3.msra.mxu1 %v3650_v28 }
 0x6c4   :  { %2921 = vmatprep.subr.mxu1 %v3312_v2 }
 0x6c5   :  { %2922 = vmatpush3.msra.mxu1 %v3668_v31 }
 0x6c6   :  { %2923 = vmatprep.subr.mxu1 %v3312_v2 }
 0x6c7   :  { %2924 = vmatpush3.msra.mxu1 %v3673_v32 }
 0x6c8   :  { %2925 = vmatprep.subr.mxu1 %v3312_v2 }
 0x6c9   :  { %2926 = vmatpush3.msra.mxu1 %v3681_v34 }
 0x6ca   :  { %2927 = vmatprep.subr.mxu1 %v3312_v2 }
 0x6cb   :  { %2928 = vmatpush3.msra.mxu1 %v3688_v35 }
 0x6cc   :  { %2929 = vmatprep.subr.mxu1 %v3312_v2 }
 0x6cd   :  { %2930 = vmatpush3.msra.mxu1 %v3695_v36 }
 0x6ce   :  { %2953 = vmatprep.subr.mxu1 %v3312_v2 }
 0x77e   :  { %v881_v63 = vpop.f32.mrf.mxu1 }
 0x77f   :  { %v882_v0 = vadd.f32 %v881_v63, %v811_v62  ;;  %v1568_v63 = vld [vmem:[%s4283_s1 + $0x110] sm:$0xff] }
 0x780   :  { %v2895_v3 = vpop.f32.mrf.mxu1 }
 0x781   :  { %v886_v1 = vrot.slane %v882_v0, 7  ;;  %v888_v4 = vrot.slane %v882_v0, 5  ;;  %v890_v5 = vrot.slane %v882_v0, 3  ;;  %v892_v6 = vrot.slane %v882_v0, 1  ;;  %v1566_v3 = vld [vmem:[%s4283_s1 + $0x100] sm:$0xff] }
 0x783   :  { %v894_v7 = vsel %vm116_vm3, %v886_v1, %v888_v4 }
 0x784   :  { %v895_v8 = vsel %vm118_vm4, %v894_v7, %v890_v5  ;;  %v3953_v7 = vld [vmem:[%s4283_s1 + $0x148] sm:$0xff] }
 0x785   :  { %v896_v9 = vsel %vm120_vm5, %v895_v8, %v892_v6  ;;  %v1562_v8 = vld [vmem:[%s4283_s1 + $0xe0] sm:$0xff] }
 0x786   :  { %v897_v11 = vsel %vm122_vm6, %v896_v9, %v886_v1  ;;  %v1565_v1 = vld [vmem:[%s4283_s1 + $0xf8] sm:$0xff]  ;;  %v3963_v9 = vld [vmem:[%s4283_s1 + $0x140] sm:$0xff] }
 0x787   :  { %v898_v12 = vsel %vm124_vm7, %v897_v11, %v888_v4  ;;  %v1564_v4 = vld [vmem:[%s4283_s1 + $0xf0] sm:$0xff]  ;;  %v1561_v11 = vld [vmem:[%s4283_s1 + $0xd8] sm:$0xff] }
 0x788   :  { %v899_v13 = vsel %vm126_vm8, %v898_v12, %v890_v5  ;;  %v1563_v5 = vld [vmem:[%s4283_s1 + $0xe8] sm:$0xff]  ;;  %v3977_v12 = vld [vmem:[%s4283_s1 + $0x138] sm:$0xff] }
 0x789   :  { %v900_v10 = vsel %vm128_vm9, %v899_v13, %v892_v6  ;;  %v3947_v6 = vld [vmem:[%s4283_s1 + $0x150] sm:$0xff] }
 0x78a   :  { %v3776_v14 = vsel %vm17_vm10, %v882_v0, %v900_v10  ;;  %v1567_v0 = vld [vmem:[%s4283_s1 + $0x108] sm:$0xff]  ;;  %v3982_v13 = vld [vmem:[%s4283_s1 + $0x130] sm:$0xff] }
 0x78b   :  { %v975_v16 = vadd.f32 %v971_v37, %v3776_v14  ;;  %v3990_v10 = vld [vmem:[%s4283_s1 + $0x128] sm:$0xff] }
 0x78d   :  { %3257 = vtanh.f32 %v975_v16  ;;  %v3997_v16 = vld [vmem:[%s4283_s1 + $0x120] sm:$0xff] }
 0x79a   :  { %v3779_v17 = vpop.eup %3257 }
 0x79b   :  { %2932 = vmatmul.mubr.msk.f32.vlgmr.msra.gmra.mxu1 %vm133_vm2, %v3779_v17 }
 0x79c   :  { %2954 = vmatpush3.msra.mxu1 %v3634_v25  ;;  %2969 = vmatprep.mubr.msk.f32.mxu1 %vm3313_vm1, %v3312_v2 }
 0x79d   :  { %2955 = vmatprep.subr.mxu1 %v3312_v2 }
 0x79e   :  { %2956 = vmatpush3.msra.mxu1 %v3639_v26 }
 0x79f   :  { %2957 = vmatprep.subr.mxu1 %v3312_v2 }
 0x7a0   :  { %2958 = vmatpush3.msra.mxu1 %v3650_v28 }
 0x7a1   :  { %2959 = vmatprep.subr.mxu1 %v3312_v2 }
 0x7a2   :  { %2960 = vmatpush3.msra.mxu1 %v3668_v31 }
 0x7a3   :  { %2961 = vmatprep.subr.mxu1 %v3312_v2 }
 0x7a4   :  { %2962 = vmatpush3.msra.mxu1 %v3673_v32 }
 0x7a5   :  { %2963 = vmatprep.subr.mxu1 %v3312_v2 }
 0x7a6   :  { %2964 = vmatpush3.msra.mxu1 %v3681_v34 }
 0x7a7   :  { %2965 = vmatprep.subr.mxu1 %v3312_v2 }
 0x7a8   :  { %2966 = vmatpush3.msra.mxu1 %v3688_v35 }
 0x7a9   :  { %2967 = vmatprep.subr.mxu1 %v3312_v2 }
 0x7aa   :  { %2968 = vmatpush3.msra.mxu1 %v3695_v36 }
 0x7ab   :  { %2991 = vmatprep.subr.mxu1 %v3312_v2 }
 0x85b   :  { %v1046_v18 = vpop.f32.mrf.mxu1 }
 0x85c   :  { %v1051_v19 = vrot.slane %v1046_v18, 7  ;;  %v4004_v18 = vld [vmem:[%s4283_s1 + $0x118] sm:$0xff] }
 0x85d   :  { %v2933_v20 = vpop.f32.mrf.mxu1 }
 0x85e   :  { %v1053_v21 = vadd.f32 %v1051_v19, %v3776_v14  ;;  %v4009_v19 = vld [vmem:[%s4283_s1] sm:$0xff] }
 0x85f   :  { %v1671_v20 = vrot.slane %v4009_v19, 5 }
 0x860   :  { %3259 = vtanh.f32 %v1053_v21 }
 0x86d   :  { %v3802_v22 = vpop.eup %3259 }
 0x86e   :  { %v1056_v23 = vrot.slane %v3802_v22, 1  ;;  %v1529_v40 = vsel %vm116_vm3, %v3779_v17, %v3802_v22 }
 0x870   :  { %2951 = vmatmul.mubr.msk.f32.vlgmr.msra.gmra.mxu0 %vm133_vm2, %v1056_v23 }
 0x871   :  { %2973 = vmatpush3.msra.mxu0 %v3634_v25  ;;  %2988 = vmatprep.mubr.msk.f32.mxu0 %vm3313_vm1, %v3312_v2 }
 0x872   :  { %2974 = vmatprep.subr.mxu0 %v3312_v2 }
 0x873   :  { %2975 = vmatpush3.msra.mxu0 %v3639_v26 }
 0x874   :  { %2976 = vmatprep.subr.mxu0 %v3312_v2 }
 0x875   :  { %2977 = vmatpush3.msra.mxu0 %v3650_v28 }
 0x876   :  { %2978 = vmatprep.subr.mxu0 %v3312_v2 }
 0x877   :  { %2979 = vmatpush3.msra.mxu0 %v3668_v31 }
 0x878   :  { %2980 = vmatprep.subr.mxu0 %v3312_v2 }
 0x879   :  { %2981 = vmatpush3.msra.mxu0 %v3673_v32 }
 0x87a   :  { %2982 = vmatprep.subr.mxu0 %v3312_v2 }
 0x87b   :  { %2983 = vmatpush3.msra.mxu0 %v3681_v34 }
 0x87c   :  { %2984 = vmatprep.subr.mxu0 %v3312_v2 }
 0x87d   :  { %2985 = vmatpush3.msra.mxu0 %v3688_v35 }
 0x87e   :  { %2986 = vmatprep.subr.mxu0 %v3312_v2 }
 0x87f   :  { %2987 = vmatpush3.msra.mxu0 %v3695_v36 }
 0x880   :  { %3010 = vmatprep.subr.mxu0 %v3312_v2 }
 0x930   :  { %v1125_v27 = vpop.f32.mrf.mxu0 }
 0x931   :  { %v1130_v29 = vrot.slane %v1125_v27, 6 }
 0x932   :  { %v2952_v30 = vpop.f32.mrf.mxu0 }
 0x933   :  { %v1132_v38 = vadd.f32 %v1130_v29, %v3776_v14 }
 0x935   :  { %3261 = vtanh.f32 %v1132_v38 }
 0x942   :  { %v3825_v39 = vpop.eup %3261 }
 0x943   :  { %v1135_v41 = vrot.slane %v3825_v39, 2  ;;  %v1530_v43 = vsel %vm118_vm4, %v1529_v40, %v3825_v39 }
 0x945   :  { %2970 = vmatmul.mubr.msk.f32.vlgmr.msra.gmra.mxu1 %vm133_vm2, %v1135_v41 }
 0x946   :  { %2992 = vmatpush3.msra.mxu1 %v3634_v25  ;;  %3007 = vmatprep.mubr.msk.f32.mxu1 %vm3313_vm1, %v3312_v2 }
 0x947   :  { %2993 = vmatprep.subr.mxu1 %v3312_v2 }
 0x948   :  { %2994 = vmatpush3.msra.mxu1 %v3639_v26 }
 0x949   :  { %2995 = vmatprep.subr.mxu1 %v3312_v2 }
 0x94a   :  { %2996 = vmatpush3.msra.mxu1 %v3650_v28 }
 0x94b   :  { %2997 = vmatprep.subr.mxu1 %v3312_v2 }
 0x94c   :  { %2998 = vmatpush3.msra.mxu1 %v3668_v31 }
 0x94d   :  { %2999 = vmatprep.subr.mxu1 %v3312_v2 }
 0x94e   :  { %3000 = vmatpush3.msra.mxu1 %v3673_v32 }
 0x94f   :  { %3001 = vmatprep.subr.mxu1 %v3312_v2 }
 0x950   :  { %3002 = vmatpush3.msra.mxu1 %v3681_v34 }
 0x951   :  { %3003 = vmatprep.subr.mxu1 %v3312_v2 }
 0x952   :  { %3004 = vmatpush3.msra.mxu1 %v3688_v35 }
 0x953   :  { %3005 = vmatprep.subr.mxu1 %v3312_v2 }
 0x954   :  { %3006 = vmatpush3.msra.mxu1 %v3695_v36 }
 0x955   :  { %3029 = vmatprep.subr.mxu1 %v3312_v2 }
 0xa05   :  { %v1204_v46 = vpop.f32.mrf.mxu1 }
 0xa06   :  { %v1209_v47 = vrot.slane %v1204_v46, 5 }
 0xa07   :  { %v2971_v49 = vpop.f32.mrf.mxu1 }
 0xa08   :  { %v1211_v50 = vadd.f32 %v1209_v47, %v3776_v14 }
 0xa0a   :  { %3263 = vtanh.f32 %v1211_v50  ;;  %v1547_v50 = vrot.slane %v3825_v39, 5 }
 0xa17   :  { %v3853_v51 = vpop.eup %3263 }
 0xa18   :  { %v1214_v52 = vrot.slane %v3853_v51, 3  ;;  %v1531_v33 = vsel %vm120_vm5, %v1530_v43, %v3853_v51  ;;  %v1545_v47 = vrot.slane %v3853_v51, 7 }
 0xa1a   :  { %2989 = vmatmul.mubr.msk.f32.vlgmr.msra.gmra.mxu0 %vm133_vm2, %v1214_v52  ;;  %v1549_v52 = vrot.slane %v3802_v22, 3 }
 0xa1b   :  { %3011 = vmatpush3.msra.mxu0 %v3634_v25  ;;  %3026 = vmatprep.mubr.msk.f32.mxu0 %vm3313_vm1, %v3312_v2 }
 0xa1c   :  { %3012 = vmatprep.subr.mxu0 %v3312_v2 }
 0xa1d   :  { %3013 = vmatpush3.msra.mxu0 %v3639_v26 }
 0xa1e   :  { %3014 = vmatprep.subr.mxu0 %v3312_v2 }
 0xa1f   :  { %3015 = vmatpush3.msra.mxu0 %v3650_v28 }
 0xa20   :  { %3016 = vmatprep.subr.mxu0 %v3312_v2 }
 0xa21   :  { %3017 = vmatpush3.msra.mxu0 %v3668_v31 }
 0xa22   :  { %3018 = vmatprep.subr.mxu0 %v3312_v2 }
 0xa23   :  { %3019 = vmatpush3.msra.mxu0 %v3673_v32 }
 0xa24   :  { %3020 = vmatprep.subr.mxu0 %v3312_v2 }
 0xa25   :  { %3021 = vmatpush3.msra.mxu0 %v3681_v34 }
 0xa26   :  { %3022 = vmatprep.subr.mxu0 %v3312_v2 }
 0xa27   :  { %3023 = vmatpush3.msra.mxu0 %v3688_v35 }
 0xa28   :  { %3024 = vmatprep.subr.mxu0 %v3312_v2 }
 0xa29   :  { %3025 = vmatpush3.msra.mxu0 %v3695_v36 }
 0xa2a   :  { %3048 = vmatprep.subr.mxu0 %v3312_v2 }
 0xada   :  { %v1283_v53 = vpop.f32.mrf.mxu0 }
 0xadb   :  { %v1288_v54 = vrot.slane %v1283_v53, 4  ;;  %v1551_v53 = vrot.slane %v3779_v17, 1 }
 0xadc   :  { %v2990_v55 = vpop.f32.mrf.mxu0 }
 0xadd   :  { %v1290_v57 = vadd.f32 %v1288_v54, %v3776_v14 }
 0xadf   :  { %3265 = vtanh.f32 %v1290_v57 }
 0xaec   :  { %v3878_v58 = vpop.eup %3265 }
 0xaed   :  { %v1293_v59 = vrot.slane %v3878_v58, 4  ;;  %v1532_v56 = vsel %vm122_vm6, %v1531_v33, %v3878_v58  ;;  %v1543_v43 = vrot.slane %v3878_v58, 1  ;;  %v1579_v58 = vsub.s32 2, %v3451_v15 }
 0xaef   :  { %3008 = vmatmul.mubr.msk.f32.vlgmr.msra.gmra.mxu1 %vm133_vm2, %v1293_v59  ;;  %v1580_v59 = vrot.slane %v4009_v19, %v1579_v58 }
 0xaf0   :  { %3030 = vmatpush3.msra.mxu1 %v3634_v25  ;;  %3045 = vmatprep.mubr.msk.f32.mxu1 %vm3313_vm1, %v3312_v2 }
 0xaf1   :  { %3031 = vmatprep.subr.mxu1 %v3312_v2 }
 0xaf2   :  { %3032 = vmatpush3.msra.mxu1 %v3639_v26 }
 0xaf3   :  { %3033 = vmatprep.subr.mxu1 %v3312_v2 }
 0xaf4   :  { %3034 = vmatpush3.msra.mxu1 %v3650_v28 }
 0xaf5   :  { %3035 = vmatprep.subr.mxu1 %v3312_v2 }
 0xaf6   :  { %3036 = vmatpush3.msra.mxu1 %v3668_v31 }
 0xaf7   :  { %3037 = vmatprep.subr.mxu1 %v3312_v2 }
 0xaf8   :  { %3038 = vmatpush3.msra.mxu1 %v3673_v32 }
 0xaf9   :  { %3039 = vmatprep.subr.mxu1 %v3312_v2 }
 0xafa   :  { %3040 = vmatpush3.msra.mxu1 %v3681_v34 }
 0xafb   :  { %3041 = vmatprep.subr.mxu1 %v3312_v2 }
 0xafc   :  { %3042 = vmatpush3.msra.mxu1 %v3688_v35 }
 0xafd   :  { %3043 = vmatprep.subr.mxu1 %v3312_v2 }
 0xafe   :  { %3044 = vmatpush3.msra.mxu1 %v3695_v36 }
 0xaff   :  { %3067 = vmatprep.subr.mxu1 %v3312_v2 }
 0xbaf   :  { %v1362_v25 = vpop.f32.mrf.mxu1 }
 0xbb0   :  { %v1367_v26 = vrot.slane %v1362_v25, 3 }
 0xbb1   :  { %v3009_v28 = vpop.f32.mrf.mxu1 }
 0xbb2   :  { %v1369_v31 = vadd.f32 %v1367_v26, %v3776_v14 }
 0xbb4   :  { %3267 = vtanh.f32 %v1369_v31 }
 0xbc1   :  { %v3903_v32 = vpop.eup %3267 }
 0xbc2   :  { %v1372_v34 = vrot.slane %v3903_v32, 5  ;;  %v1533_v60 = vsel %vm124_vm7, %v1532_v56, %v3903_v32  ;;  %v1541_v41 = vrot.slane %v3903_v32, 3 }
 0xbc4   :  { %3027 = vmatmul.mubr.msk.f32.vlgmr.msra.gmra.mxu0 %vm133_vm2, %v1372_v34 }
 0xbc5   :  { %3064 = vmatprep.mubr.msk.f32.mxu0 %vm3313_vm1, %v3312_v2  ;;  %3049 = vmatpush3.msra.mxu0 %v1568_v63 }
 0xbc6   :  { %3050 = vmatprep.subr.mxu0 %v3312_v2 }
 0xbc7   :  { %3051 = vmatpush3.msra.mxu0 %v1567_v0 }
 0xbc8   :  { %3052 = vmatprep.subr.mxu0 %v3312_v2 }
 0xbc9   :  { %3053 = vmatpush3.msra.mxu0 %v1566_v3 }
 0xbca   :  { %3054 = vmatprep.subr.mxu0 %v3312_v2 }
 0xbcb   :  { %3055 = vmatpush3.msra.mxu0 %v1565_v1 }
 0xbcc   :  { %3056 = vmatprep.subr.mxu0 %v3312_v2 }
 0xbcd   :  { %3057 = vmatpush3.msra.mxu0 %v1564_v4 }
 0xbce   :  { %3058 = vmatprep.subr.mxu0 %v3312_v2 }
 0xbcf   :  { %3059 = vmatpush3.msra.mxu0 %v1563_v5 }
 0xbd0   :  { %3060 = vmatprep.subr.mxu0 %v3312_v2 }
 0xbd1   :  { %3061 = vmatpush3.msra.mxu0 %v1562_v8 }
 0xbd2   :  { %3062 = vmatprep.subr.mxu0 %v3312_v2 }
 0xbd3   :  { %3063 = vmatpush3.msra.mxu0 %v1561_v11 }
 0xbd4   :  { %3086 = vmatprep.subr.mxu0 %v3312_v2 }
 0xc84   :  { %v1441_v35 = vpop.f32.mrf.mxu0 }
 0xc85   :  { %v1446_v36 = vrot.slane %v1441_v35, 2 }
 0xc86   :  { %v3028_v48 = vpop.f32.mrf.mxu0 }
 0xc87   :  { %v1448_v37 = vadd.f32 %v1446_v36, %v3776_v14 }
 0xc89   :  { %3269 = vtanh.f32 %v1448_v37 }
 0xc96   :  { %v3912_v42 = vpop.eup %3269 }
 0xc97   :  { %v1451_v61 = vrot.slane %v3912_v42, 6  ;;  %v3917_v62 = vsel %vm126_vm8, %v1533_v60, %v3912_v42  ;;  %v1539_v40 = vrot.slane %v3912_v42, 5 }
 0xc99   :  { %3046 = vmatmul.mubr.msk.f32.vlgmr.msra.gmra.mxu1 %vm133_vm2, %v1451_v61 }
 0xc9a   :  { %3083 = vmatprep.mubr.msk.f32.mxu1 %vm3313_vm1, %v3312_v2  ;;  %3068 = vmatpush3.msra.mxu1 %v3947_v6 }
 0xc9b   :  { %3069 = vmatprep.subr.mxu1 %v3312_v2 }
 0xc9c   :  { %3070 = vmatpush3.msra.mxu1 %v3953_v7 }
 0xc9d   :  { %3071 = vmatprep.subr.mxu1 %v3312_v2 }
 0xc9e   :  { %3072 = vmatpush3.msra.mxu1 %v3963_v9 }
 0xc9f   :  { %3073 = vmatprep.subr.mxu1 %v3312_v2 }
 0xca0   :  { %3074 = vmatpush3.msra.mxu1 %v3977_v12 }
 0xca1   :  { %3075 = vmatprep.subr.mxu1 %v3312_v2 }
 0xca2   :  { %3076 = vmatpush3.msra.mxu1 %v3982_v13 }
 0xca3   :  { %3077 = vmatprep.subr.mxu1 %v3312_v2 }
 0xca4   :  { %3078 = vmatpush3.msra.mxu1 %v3990_v10 }
 0xca5   :  { %3079 = vmatprep.subr.mxu1 %v3312_v2 }
 0xca6   :  { %3080 = vmatpush3.msra.mxu1 %v3997_v16 }
 0xca7   :  { %3081 = vmatprep.subr.mxu1 %v3312_v2 }
 0xca8   :  { %3082 = vmatpush3.msra.mxu1 %v4004_v18 }
 0xca9   :  { %3084 = vmatmul.mubr.msk.f32.vlgmr.msra.gmra.mxu1 %vm133_vm2, %v1671_v20  ;;  %3105 = vmatprep.subr.mxu1 %v3312_v2 }
 0xcaa   :  { %3106 = vmatpush3.msra.mxu1 %v3947_v6  ;;  %3121 = vmatprep.mubr.msk.f32.mxu1 %vm3313_vm1, %v3312_v2 }
 0xcab   :  { %3107 = vmatprep.subr.mxu1 %v3312_v2 }
 0xcac   :  { %3108 = vmatpush3.msra.mxu1 %v3953_v7 }
 0xcad   :  { %3109 = vmatprep.subr.mxu1 %v3312_v2 }
 0xcae   :  { %3110 = vmatpush3.msra.mxu1 %v3963_v9 }
 0xcaf   :  { %3111 = vmatprep.subr.mxu1 %v3312_v2 }
 0xcb0   :  { %3112 = vmatpush3.msra.mxu1 %v3977_v12 }
 0xcb1   :  { %3113 = vmatprep.subr.mxu1 %v3312_v2 }
 0xcb2   :  { %3114 = vmatpush3.msra.mxu1 %v3982_v13 }
 0xcb3   :  { %3115 = vmatprep.subr.mxu1 %v3312_v2 }
 0xcb4   :  { %3116 = vmatpush3.msra.mxu1 %v3990_v10 }
 0xcb5   :  { %3117 = vmatprep.subr.mxu1 %v3312_v2 }
 0xcb6   :  { %3118 = vmatpush3.msra.mxu1 %v3997_v16 }
 0xcb7   :  { %3119 = vmatprep.subr.mxu1 %v3312_v2 }
 0xcb8   :  { %3120 = vmatpush3.msra.mxu1 %v4004_v18 }
 0xcb9   :  { %3143 = vmatprep.subr.mxu1 %v3312_v2 }
 0xd59   :  { %v1520_v21 = vpop.f32.mrf.mxu1 }
 0xd5a   :  { %v1525_v23 = vrot.slane %v1520_v21, 1 }
 0xd5b   :  { %v3047_v27 = vpop.f32.mrf.mxu1 }
 0xd5c   :  { %v1527_v29 = vadd.f32 %v1525_v23, %v3776_v14 }
 0xd5e   :  { %3271 = vtanh.f32 %v1527_v29 }
 0xd69   :  { %v1740_v17 = vpop.f32.mrf.mxu1 }
 0xd6b   :  { %v4036_v30 = vpop.eup %3271  ;;  %v3085_v22 = vpop.f32.mrf.mxu1 }
 0xd6c   :  { %v1537_v38 = vrot.slane %v4036_v30, 7  ;;  %v1535_v51 = vsel %vm128_vm9, %v3917_v62, %v4036_v30 }
 0xd6e   :  { %v1553_v46 = vsel %vm116_vm3, %v1537_v38, %v1539_v40 }
 0xd6f   :  { %v1554_v49 = vsel %vm118_vm4, %v1553_v46, %v1541_v41 }
 0xd70   :  { %v1555_v14 = vsel %vm120_vm5, %v1554_v49, %v1543_v43 }
 0xd71   :  { %v1556_v33 = vsel %vm122_vm6, %v1555_v14, %v1545_v47 }
 0xd72   :  { %v1557_v54 = vsel %vm124_vm7, %v1556_v33, %v1547_v50 }
 0xd73   :  { %v1558_v55 = vsel %vm126_vm8, %v1557_v54, %v1549_v52 }
 0xd74   :  { %v1559_v57 = vsel %vm128_vm9, %v1558_v55, %v1551_v53 }
 0xd75   :  { %v1560_v39 = vsel %vm17_vm10, %v1535_v51, %v1559_v57 }
 0xd76   :  { %3065 = vmatmul.mubr.msk.f32.vlgmr.msra.gmra.mxu0 %vm133_vm2, %v1560_v39 }
 0xd77   :  { %3087 = vmatpush3.msra.mxu0 %v3947_v6  ;;  %3102 = vmatprep.mubr.msk.f32.mxu0 %vm3313_vm1, %v3312_v2 }
 0xd78   :  { %3088 = vmatprep.subr.mxu0 %v3312_v2 }
 0xd79   :  { %3089 = vmatpush3.msra.mxu0 %v3953_v7 }
 0xd7a   :  { %3090 = vmatprep.subr.mxu0 %v3312_v2 }
 0xd7b   :  { %3091 = vmatpush3.msra.mxu0 %v3963_v9 }
 0xd7c   :  { %3092 = vmatprep.subr.mxu0 %v3312_v2 }
 0xd7d   :  { %3093 = vmatpush3.msra.mxu0 %v3977_v12 }
 0xd7e   :  { %3094 = vmatprep.subr.mxu0 %v3312_v2 }
 0xd7f   :  { %3095 = vmatpush3.msra.mxu0 %v3982_v13 }
 0xd80   :  { %3096 = vmatprep.subr.mxu0 %v3312_v2 }
 0xd81   :  { %3097 = vmatpush3.msra.mxu0 %v3990_v10 }
 0xd82   :  { %3098 = vmatprep.subr.mxu0 %v3312_v2 }
 0xd83   :  { %3099 = vmatpush3.msra.mxu0 %v3997_v16 }
 0xd84   :  { %3100 = vmatprep.subr.mxu0 %v3312_v2 }
 0xd85   :  { %3101 = vmatpush3.msra.mxu0 %v4004_v18 }
 0xd86   :  { %3124 = vmatprep.subr.mxu0 %v3312_v2 }
 0xe36   :  { %v1650_v56 = vpop.f32.mrf.mxu0 }
 0xe37   :  { %v1651_v25 = vadd.f32 %v1650_v56, %v1580_v59 }
 0xe38   :  { %v3066_v26 = vpop.f32.mrf.mxu0 }
 0xe39   :  { %v1655_v28 = vrot.slane %v1651_v25, 7  ;;  %v1657_v31 = vrot.slane %v1651_v25, 5  ;;  %v1659_v32 = vrot.slane %v1651_v25, 3  ;;  %v1661_v34 = vrot.slane %v1651_v25, 1  ;;  %v2345_v26 = vld [vmem:[%s4283_s1 + $0x190] sm:$0xff] }
 0xe3b   :  { %v1663_v60 = vsel %vm116_vm3, %v1655_v28, %v1657_v31 }
 0xe3c   :  { %v1664_v35 = vsel %vm118_vm4, %v1663_v60, %v1659_v32  ;;  %v2340_v60 = vld [vmem:[%s4283_s1 + $0x168] sm:$0xff] }
 0xe3d   :  { %v1665_v36 = vsel %vm120_vm5, %v1664_v35, %v1661_v34  ;;  %v2339_v35 = vld [vmem:[%s4283_s1 + $0x160] sm:$0xff] }
 0xe3e   :  { %v1666_v48 = vsel %vm122_vm6, %v1665_v36, %v1655_v28  ;;  %v2344_v28 = vld [vmem:[%s4283_s1 + $0x188] sm:$0xff]  ;;  %v2338_v36 = vld [vmem:[%s4283_s1 + $0x158] sm:$0xff] }
 0xe3f   :  { %v1667_v37 = vsel %vm124_vm7, %v1666_v48, %v1657_v31  ;;  %v2343_v31 = vld [vmem:[%s4283_s1 + $0x180] sm:$0xff] }
 0xe40   :  { %v1668_v42 = vsel %vm126_vm8, %v1667_v37, %v1659_v32  ;;  %v2342_v32 = vld [vmem:[%s4283_s1 + $0x178] sm:$0xff] }
 0xe41   :  { %v1669_v61 = vsel %vm128_vm9, %v1668_v42, %v1661_v34  ;;  %v2341_v34 = vld [vmem:[%s4283_s1 + $0x170] sm:$0xff] }
 0xe42   :  { %v4088_v62 = vsel %vm17_vm10, %v1651_v25, %v1669_v61 }
 0xe43   :  { %v1744_v63 = vadd.f32 %v1740_v17, %v4088_v62 }
 0xe45   :  { %3273 = vtanh.f32 %v1744_v63  ;;  %v2330_v63 = vrot.slane %v4036_v30, 6 }
 0xe52   :  { %v4091_v0 = vpop.eup %3273 }
 0xe53   :  { %3103 = vmatmul.mubr.msk.f32.vlgmr.msra.gmra.mxu0 %vm133_vm2, %v4091_v0 }
 0xe54   :  { %3125 = vmatpush3.msra.mxu0 %v3947_v6  ;;  %3140 = vmatprep.mubr.msk.f32.mxu0 %vm3313_vm1, %v3312_v2 }
 0xe55   :  { %3126 = vmatprep.subr.mxu0 %v3312_v2 }
 0xe56   :  { %3127 = vmatpush3.msra.mxu0 %v3953_v7 }
 0xe57   :  { %3128 = vmatprep.subr.mxu0 %v3312_v2 }
 0xe58   :  { %3129 = vmatpush3.msra.mxu0 %v3963_v9 }
 0xe59   :  { %3130 = vmatprep.subr.mxu0 %v3312_v2 }
 0xe5a   :  { %3131 = vmatpush3.msra.mxu0 %v3977_v12 }
 0xe5b   :  { %3132 = vmatprep.subr.mxu0 %v3312_v2 }
 0xe5c   :  { %3133 = vmatpush3.msra.mxu0 %v3982_v13 }
 0xe5d   :  { %3134 = vmatprep.subr.mxu0 %v3312_v2 }
 0xe5e   :  { %3135 = vmatpush3.msra.mxu0 %v3990_v10 }
 0xe5f   :  { %3136 = vmatprep.subr.mxu0 %v3312_v2 }
 0xe60   :  { %3137 = vmatpush3.msra.mxu0 %v3997_v16 }
 0xe61   :  { %3138 = vmatprep.subr.mxu0 %v3312_v2 }
 0xe62   :  { %3139 = vmatpush3.msra.mxu0 %v4004_v18 }
 0xe63   :  { %3162 = vmatprep.subr.mxu0 %v3312_v2 }
 0xf13   :  { %v1815_v3 = vpop.f32.mrf.mxu0 }
 0xf14   :  { %v1820_v1 = vrot.slane %v1815_v3, 7 }
 0xf15   :  { %v3104_v4 = vpop.f32.mrf.mxu0 }
 0xf16   :  { %v1822_v5 = vadd.f32 %v1820_v1, %v4088_v62 }
 0xf18   :  { %3275 = vtanh.f32 %v1822_v5 }
 0xf25   :  { %v4114_v8 = vpop.eup %3275 }
 0xf26   :  { %v1825_v11 = vrot.slane %v4114_v8, 1  ;;  %v2298_v38 = vsel %vm116_vm3, %v4091_v0, %v4114_v8 }
 0xf28   :  { %3122 = vmatmul.mubr.msk.f32.vlgmr.msra.gmra.mxu1 %vm133_vm2, %v1825_v11  ;;  %v2334_v11 = vsel %vm116_vm3, %v768_v45, %v2330_v63  ;;  %v2318_v45 = vrot.slane %v4114_v8, 3 }
 0xf29   :  { %3144 = vmatpush3.msra.mxu1 %v3947_v6  ;;  %3159 = vmatprep.mubr.msk.f32.mxu1 %vm3313_vm1, %v3312_v2 }
 0xf2a   :  { %3145 = vmatprep.subr.mxu1 %v3312_v2 }
 0xf2b   :  { %3146 = vmatpush3.msra.mxu1 %v3953_v7 }
 0xf2c   :  { %3147 = vmatprep.subr.mxu1 %v3312_v2 }
 0xf2d   :  { %3148 = vmatpush3.msra.mxu1 %v3963_v9 }
 0xf2e   :  { %3149 = vmatprep.subr.mxu1 %v3312_v2 }
 0xf2f   :  { %3150 = vmatpush3.msra.mxu1 %v3977_v12 }
 0xf30   :  { %3151 = vmatprep.subr.mxu1 %v3312_v2 }
 0xf31   :  { %3152 = vmatpush3.msra.mxu1 %v3982_v13 }
 0xf32   :  { %3153 = vmatprep.subr.mxu1 %v3312_v2 }
 0xf33   :  { %3154 = vmatpush3.msra.mxu1 %v3990_v10 }
 0xf34   :  { %3155 = vmatprep.subr.mxu1 %v3312_v2 }
 0xf35   :  { %3156 = vmatpush3.msra.mxu1 %v3997_v16 }
 0xf36   :  { %3157 = vmatprep.subr.mxu1 %v3312_v2 }
 0xf37   :  { %3158 = vmatpush3.msra.mxu1 %v4004_v18 }
 0xf38   :  { %3181 = vmatprep.subr.mxu1 %v3312_v2 }
 0xfe8   :  { %v1894_v20 = vpop.f32.mrf.mxu1 }
 0xfe9   :  { %v1899_v21 = vrot.slane %v1894_v20, 6 }
 0xfea   :  { %v3123_v23 = vpop.f32.mrf.mxu1 }
 0xfeb   :  { %v1901_v27 = vadd.f32 %v1899_v21, %v4088_v62 }
 0xfed   :  { %3277 = vtanh.f32 %v1901_v27 }
 0xffa   :  { %v4137_v29 = vpop.eup %3277 }
 0xffb   :  { %v1904_v40 = vrot.slane %v4137_v29, 2  ;;  %v2299_v41 = vsel %vm118_vm4, %v2298_v38, %v4137_v29  ;;  %v2316_v27 = vrot.slane %v4137_v29, 5  ;;  %v2421_v29 = vsub.s32 6, %v3451_v15 }
 0xffd   :  { %3141 = vmatmul.mubr.msk.f32.vlgmr.msra.gmra.mxu0 %vm133_vm2, %v1904_v40  ;;  %v2320_v40 = vrot.slane %v4091_v0, 1  ;;  %v2422_v8 = vrot.slane %v4009_v19, %v2421_v29 }
 0xffe   :  { %3163 = vmatpush3.msra.mxu0 %v3947_v6  ;;  %3178 = vmatprep.mubr.msk.f32.mxu0 %vm3313_vm1, %v3312_v2 }
 0xfff   :  { %3164 = vmatprep.subr.mxu0 %v3312_v2 }
0x1000   :  { %3165 = vmatpush3.msra.mxu0 %v3953_v7 }
0x1001   :  { %3166 = vmatprep.subr.mxu0 %v3312_v2 }
0x1002   :  { %3167 = vmatpush3.msra.mxu0 %v3963_v9 }
0x1003   :  { %3168 = vmatprep.subr.mxu0 %v3312_v2 }
0x1004   :  { %3169 = vmatpush3.msra.mxu0 %v3977_v12 }
0x1005   :  { %3170 = vmatprep.subr.mxu0 %v3312_v2 }
0x1006   :  { %3171 = vmatpush3.msra.mxu0 %v3982_v13 }
0x1007   :  { %3172 = vmatprep.subr.mxu0 %v3312_v2 }
0x1008   :  { %3173 = vmatpush3.msra.mxu0 %v3990_v10 }
0x1009   :  { %3174 = vmatprep.subr.mxu0 %v3312_v2 }
0x100a   :  { %3175 = vmatpush3.msra.mxu0 %v3997_v16 }
0x100b   :  { %3176 = vmatprep.subr.mxu0 %v3312_v2 }
0x100c   :  { %3177 = vmatpush3.msra.mxu0 %v4004_v18 }
0x100d   :  { %3200 = vmatprep.subr.mxu0 %v3312_v2 }
0x10bd   :  { %v1973_v43 = vpop.f32.mrf.mxu0 }
0x10be   :  { %v1978_v46 = vrot.slane %v1973_v43, 5 }
0x10bf   :  { %v3142_v47 = vpop.f32.mrf.mxu0 }
0x10c0   :  { %v1980_v49 = vadd.f32 %v1978_v46, %v4088_v62 }
0x10c2   :  { %3279 = vtanh.f32 %v1980_v49 }
0x10cf   :  { %v4165_v50 = vpop.eup %3279 }
0x10d0   :  { %v1983_v14 = vrot.slane %v4165_v50, 3  ;;  %v2300_v52 = vsel %vm120_vm5, %v2299_v41, %v4165_v50  ;;  %v2314_v30 = vrot.slane %v4165_v50, 7 }
0x10d2   :  { %3160 = vmatmul.mubr.msk.f32.vlgmr.msra.gmra.mxu1 %vm133_vm2, %v1983_v14 }
0x10d3   :  { %3182 = vmatpush3.msra.mxu1 %v3947_v6  ;;  %3197 = vmatprep.mubr.msk.f32.mxu1 %vm3313_vm1, %v3312_v2 }
0x10d4   :  { %3183 = vmatprep.subr.mxu1 %v3312_v2 }
0x10d5   :  { %3184 = vmatpush3.msra.mxu1 %v3953_v7 }
0x10d6   :  { %3185 = vmatprep.subr.mxu1 %v3312_v2 }
0x10d7   :  { %3186 = vmatpush3.msra.mxu1 %v3963_v9 }
0x10d8   :  { %3187 = vmatprep.subr.mxu1 %v3312_v2 }
0x10d9   :  { %3188 = vmatpush3.msra.mxu1 %v3977_v12 }
0x10da   :  { %3189 = vmatprep.subr.mxu1 %v3312_v2 }
0x10db   :  { %3190 = vmatpush3.msra.mxu1 %v3982_v13 }
0x10dc   :  { %3191 = vmatprep.subr.mxu1 %v3312_v2 }
0x10dd   :  { %3192 = vmatpush3.msra.mxu1 %v3990_v10 }
0x10de   :  { %3193 = vmatprep.subr.mxu1 %v3312_v2 }
0x10df   :  { %3194 = vmatpush3.msra.mxu1 %v3997_v16 }
0x10e0   :  { %3195 = vmatprep.subr.mxu1 %v3312_v2 }
0x10e1   :  { %3196 = vmatpush3.msra.mxu1 %v4004_v18 }
0x10e2   :  { %3219 = vmatprep.subr.mxu1 %v3312_v2 }
0x1192   :  { %v2052_v33 = vpop.f32.mrf.mxu1 }
0x1193   :  { %v2057_v53 = vrot.slane %v2052_v33, 4 }
0x1194   :  { %v3161_v54 = vpop.f32.mrf.mxu1 }
0x1195   :  { %v2059_v55 = vadd.f32 %v2057_v53, %v4088_v62 }
0x1197   :  { %3281 = vtanh.f32 %v2059_v55 }
0x11a4   :  { %v4190_v51 = vpop.eup %3281 }
0x11a5   :  { %v2062_v57 = vrot.slane %v4190_v51, 4  ;;  %v2301_v39 = vsel %vm122_vm6, %v2300_v52, %v4190_v51  ;;  %v2312_v21 = vrot.slane %v4190_v51, 1 }
0x11a7   :  { %3179 = vmatmul.mubr.msk.f32.vlgmr.msra.gmra.mxu0 %vm133_vm2, %v2062_v57 }
0x11a8   :  { %3201 = vmatpush3.msra.mxu0 %v3947_v6  ;;  %3216 = vmatprep.mubr.msk.f32.mxu0 %vm3313_vm1, %v3312_v2 }
0x11a9   :  { %3202 = vmatprep.subr.mxu0 %v3312_v2 }
0x11aa   :  { %3203 = vmatpush3.msra.mxu0 %v3953_v7 }
0x11ab   :  { %3204 = vmatprep.subr.mxu0 %v3312_v2 }
0x11ac   :  { %3205 = vmatpush3.msra.mxu0 %v3963_v9 }
0x11ad   :  { %3206 = vmatprep.subr.mxu0 %v3312_v2 }
0x11ae   :  { %3207 = vmatpush3.msra.mxu0 %v3977_v12 }
0x11af   :  { %3208 = vmatprep.subr.mxu0 %v3312_v2 }
0x11b0   :  { %3209 = vmatpush3.msra.mxu0 %v3982_v13 }
0x11b1   :  { %3210 = vmatprep.subr.mxu0 %v3312_v2 }
0x11b2   :  { %3211 = vmatpush3.msra.mxu0 %v3990_v10 }
0x11b3   :  { %3212 = vmatprep.subr.mxu0 %v3312_v2 }
0x11b4   :  { %3213 = vmatpush3.msra.mxu0 %v3997_v16 }
0x11b5   :  { %3214 = vmatprep.subr.mxu0 %v3312_v2 }
0x11b6   :  { %3215 = vmatpush3.msra.mxu0 %v4004_v18 }
0x1267   :  { %v2131_v6 = vpop.f32.mrf.mxu0 }
0x1268   :  { %v2136_v7 = vrot.slane %v2131_v6, 3 }
0x1269   :  { %v3180_v9 = vpop.f32.mrf.mxu0 }
0x126a   :  { %v2138_v12 = vadd.f32 %v2136_v7, %v4088_v62 }
0x126c   :  { %3283 = vtanh.f32 %v2138_v12 }
0x1279   :  { %v3284_v17 = vpop.eup %3283 }
0x127a   :  { %v2141_v13 = vrot.slane %v3284_v17, 5  ;;  %v2302_v22 = vsel %vm124_vm7, %v2301_v39, %v3284_v17  ;;  %v2310_v20 = vrot.slane %v3284_v17, 3 }
0x127c   :  { %3198 = vmatmul.mubr.msk.f32.vlgmr.msra.gmra.mxu1 %vm133_vm2, %v2141_v13 }
0x127d   :  { %3235 = vmatprep.mubr.msk.f32.mxu1 %vm3313_vm1, %v3312_v2  ;;  %3220 = vmatpush3.msra.mxu1 %v2345_v26 }
0x127e   :  { %3221 = vmatprep.subr.mxu1 %v3312_v2 }
0x127f   :  { %3222 = vmatpush3.msra.mxu1 %v2344_v28 }
0x1280   :  { %3223 = vmatprep.subr.mxu1 %v3312_v2 }
0x1281   :  { %3224 = vmatpush3.msra.mxu1 %v2343_v31 }
0x1282   :  { %3225 = vmatprep.subr.mxu1 %v3312_v2 }
0x1283   :  { %3226 = vmatpush3.msra.mxu1 %v2342_v32 }
0x1284   :  { %3227 = vmatprep.subr.mxu1 %v3312_v2 }
0x1285   :  { %3228 = vmatpush3.msra.mxu1 %v2341_v34 }
0x1286   :  { %3229 = vmatprep.subr.mxu1 %v3312_v2 }
0x1287   :  { %3230 = vmatpush3.msra.mxu1 %v2340_v60 }
0x1288   :  { %3231 = vmatprep.subr.mxu1 %v3312_v2 }
0x1289   :  { %3232 = vmatpush3.msra.mxu1 %v2339_v35 }
0x128a   :  { %3233 = vmatprep.subr.mxu1 %v3312_v2 }
0x128b   :  { %3234 = vmatpush3.msra.mxu1 %v2338_v36 }
0x133c   :  { %v2210_v10 = vpop.f32.mrf.mxu1 }
0x133d   :  { %v2215_v16 = vrot.slane %v2210_v10, 2 }
0x133e   :  { %v3199_v58 = vpop.f32.mrf.mxu1 }
0x133f   :  { %v2217_v18 = vadd.f32 %v2215_v16, %v4088_v62 }
0x1341   :  { %3285 = vtanh.f32 %v2217_v18 }
0x134e   :  { %v3286_v59 = vpop.eup %3285 }
0x134f   :  { %v2220_v56 = vrot.slane %v3286_v59, 6  ;;  %v2303_v25 = vsel %vm126_vm8, %v2302_v22, %v3286_v59  ;;  %v2308_v5 = vrot.slane %v3286_v59, 5 }
0x1351   :  { %3217 = vmatmul.mubr.msk.f32.vlgmr.msra.gmra.mxu0 %vm133_vm2, %v2220_v56 }
0x1411   :  { %v2289_v48 = vpop.f32.mrf.mxu0 }
0x1412   :  { %v2294_v37 = vrot.slane %v2289_v48, 1 }
0x1413   :  { %v3218_v42 = vpop.f32.mrf.mxu0 }
0x1414   :  { %v2296_v61 = vadd.f32 %v2294_v37, %v4088_v62 }
0x1416   :  { %3287 = vtanh.f32 %v2296_v61 }
0x1423   :  { %v3288_v3 = vpop.eup %3287 }
0x1424   :  { %v2332_v1 = vrot.slane %v3288_v3, 5  ;;  %v2306_v4 = vrot.slane %v3288_v3, 7  ;;  %v2304_v46 = vsel %vm128_vm9, %v2303_v25, %v3288_v3 }
0x1426   :  { %v2335_v2 = vsel %vm118_vm4, %v2334_v11, %v2332_v1  ;;  %v2322_v23 = vsel %vm116_vm3, %v2306_v4, %v2308_v5 }
0x1427   :  { %2337 = vst.msk [vmem:[%s4285_s3] sm:$0x7] %vm2336_vm11, %v2335_v2  ;;  %v2323_v62 = vsel %vm118_vm4, %v2322_v23, %v2310_v20  ;;  %s3314_s3 = smov [#allocation2]  }
0x1428   :  { %v2324_v44 = vsel %vm120_vm5, %v2323_v62, %v2312_v21  ;;  %s2432_s7 = sshll.u32 %s3314_s3, 4  ;;  %s2433_s7 = int_to_ptr.vmem [resolvable:$true] %s2432_s7 }
0x1429   :  { %v2325_v38 = vsel %vm122_vm6, %v2324_v44, %v2314_v30  ;;  %s3290_s8 = scalar_lea.vmem %s2433_s7, 128  ;;  %p3295_p1 = scmp.lt.s32.totalorder %s2433_s7, %s2433_s7 }
0x142a   :  { %v2326_v41 = vsel %vm124_vm7, %v2325_v38, %v2316_v27  ;;  %p3291_p0 = scmp.ne.s32.totalorder %s2433_s7, %s3290_s8  ;;  %p3296_p2 = scmp.lt.s32.totalorder %s3290_s8, %s3290_s8 }
0x142b   :  { %v2327_v43 = vsel %vm126_vm8, %v2326_v41, %v2318_v45 }
0x142c   :  { %v2328_v47 = vsel %vm128_vm9, %v2327_v43, %v2320_v40  ;;  %p3297_p3 = por %p3296_p2, %p3295_p1 }
0x142d   :  { %v2329_v49 = vsel %vm17_vm10, %v2304_v46, %v2328_v47 }
0x142e   :  { %3236 = vmatmul.mubr.msk.f32.vlgmr.msra.gmra.mxu1 %vm133_vm2, %v2329_v49  ;;  %p3298_p4 = pnand %p3297_p3, %p3291_p0 }
0x14ee   :  { %v2415_v0 = vpop.f32.mrf.mxu1 }
0x14ef   :  { %v2423_v50 = vadd.f32 %v2422_v8, %v2415_v0 }
0x14f0   :  { %v3237_v14 = vpop.f32.mrf.mxu1 }
0x14f1   :  { %2425 = vst.msk [vmem:[#allocation2] sm:$0xff] %vm2424_vm12, %v2423_v50 }
0x14f2   :  { %3301 = shalt.err (!%p3298_p4)
}
0x14f3   :  { %2435 = dma.vmem_to_hbm [thread:$0]  %s2433_s7, 128, %s4284_s2, [#allocation3]  }
0x14f4   :  { %3310 = dma.done.wait [#allocation3], 128  }
0x14f5   :  { %3311 = vsyncadd [#allocation3], 4294967168 }
0x14f6   :  { %2443 = vsyncpa [#allocation3], 1 }

</bundles_post_ra>
